<compile_context>
chip_gen: v7x
topology: tpu7x:2x2x1
jax: 0.10.0
libtpu: 0.0.40
codegen_flags: <defaults>
</compile_context>

<pallas_src>
import functools

import jax
import jax.numpy as jnp
from jax.experimental import pallas as pl
from jax.experimental.pallas import tpu as pltpu

NUM_POINTS = 64        # must satisfy the module's recursive divisible-by-8 precondition
NUM_SEG_CLASSES = 5
BATCH = 2
BN_EPS = 1e-5
OUT_PAD = 128          # lane-dense padded width of the final classifier output


# ----------------------------------------------------------------------------
# Parameter construction (deterministic, synthetic).  Conv1d(k=1) weight (Cout,Cin,1)
# is stored transposed as (Cin, Cout); eval-mode BatchNorm is folded into scale/bias.
# ----------------------------------------------------------------------------
def _fold_bn(w, b, gamma, beta, mean, var, eps=BN_EPS):
    scale = gamma / jnp.sqrt(var + eps)           # (Cout,)
    return w * scale[None, :], (b - mean) * scale + beta


def _init_conv_bn(key, cin, cout):
    k1, k2, k3, k4, k5, k6 = jax.random.split(key, 6)
    w = 0.1 * jax.random.normal(k1, (cin, cout), jnp.float32)
    b = 0.1 * jax.random.normal(k2, (cout,), jnp.float32)
    gamma = 1.0 + 0.1 * jax.random.normal(k3, (cout,), jnp.float32)
    beta = 0.1 * jax.random.normal(k4, (cout,), jnp.float32)
    mean = 0.1 * jax.random.normal(k5, (cout,), jnp.float32)
    var = jax.random.uniform(k6, (cout,), jnp.float32, minval=0.5, maxval=1.5)
    return _fold_bn(w, b, gamma, beta, mean, var)


def _init_conv(key, cin, cout):
    k1, k2 = jax.random.split(key)
    w = 0.1 * jax.random.normal(k1, (cin, cout), jnp.float32)
    b = 0.1 * jax.random.normal(k2, (cout,), jnp.float32)
    return w, b


def make_params(key, num_seg_classes=NUM_SEG_CLASSES):
    ks = jax.random.split(key, 8)
    p = {}
    p["w1"], p["b1"] = _init_conv_bn(ks[0], 3, 64)                 # point_features[0]
    p["w2"], p["b2"] = _init_conv_bn(ks[1], 64, 128)               # point_features[1]
    p["w3"], p["b3"] = _init_conv_bn(ks[2], 128, 256)              # point_features[2]
    p["wg"], p["bg"] = _init_conv_bn(ks[3], 256, 128)              # global_features (no ReLU)
    p["wc1"], p["bc1"] = _init_conv_bn(ks[4], 576, 256)            # classifier[0] on concat
    p["wc2"], p["bc2"] = _init_conv_bn(ks[5], 256, 128)            # classifier[1]
    p["wc3"], p["bc3"] = _init_conv(ks[6], 128, num_seg_classes)   # final Conv1d (no BN)
    return p


def pack_params(p, num_seg_classes=NUM_SEG_CLASSES):
    """Pack / pad / cast the folded parameters into the 8 kernel weight operands."""
    bf16, f32 = jnp.bfloat16, jnp.float32

    # Layer 1: K padded 3 -> 8, output lanes padded 64 -> 128 (extra cols are zero).
    w1 = jnp.zeros((8, 128), f32).at[:3, :64].set(p["w1"]).astype(bf16)

    # Column-packed trunk + classifier blocks (one wide matmul per activation).
    wp1 = jnp.zeros((128, 384), f32)
    wp1 = wp1.at[:64, :128].set(p["w2"]).at[:64, 128:384].set(p["wc1"][0:64, :]).astype(bf16)
    wp2 = jnp.concatenate([p["w3"], p["wc1"][64:192, :]], axis=1).astype(bf16)    # (128, 512)
    wp3 = jnp.concatenate([p["wg"], p["wc1"][192:448, :]], axis=1).astype(bf16)   # (256, 384)
    wc1g = p["wc1"][448:576, :].astype(bf16)                                      # (128, 256)

    wc2 = p["wc2"].astype(bf16)                                                   # (256, 128)
    wc3 = jnp.zeros((128, OUT_PAD), f32).at[:, :num_seg_classes].set(p["wc3"]).astype(bf16)

    biases = jnp.zeros((8, 256), f32)                # (8, 256): full sublane tile
    biases = biases.at[0, :64].set(p["b1"])          # h1 lanes 64:128 stay zero
    biases = biases.at[1, :128].set(p["b2"])
    biases = biases.at[2, :256].set(p["b3"])
    biases = biases.at[3, :128].set(p["bg"])
    biases = biases.at[4, :256].set(p["bc1"])
    biases = biases.at[5, :128].set(p["bc2"])
    biases = biases.at[6, :num_seg_classes].set(p["bc3"])
    return (w1, wp1, wp2, wp3, wc1g, wc2, wc3, biases)


# ----------------------------------------------------------------------------
# Pallas kernel: whole network, whole (flattened) batch, single invocation.
# ----------------------------------------------------------------------------
def pointnet_seg_kernel(x_ref, w1_ref, wp1_ref, wp2_ref, wp3_ref, wc1g_ref,
                        wc2_ref, wc3_ref, b_ref, out_ref, *, n_batch, n_points):
    f32, bf16 = jnp.float32, jnp.bfloat16

    # 128-lane-aligned static bias slices (f32)
    b1 = b_ref[0:1, 0:128]
    b2 = b_ref[1:2, 0:128]
    b3 = b_ref[2:3, 0:256]
    bg = b_ref[3:4, 0:128]
    bc1 = b_ref[4:5, 0:256]
    bc2 = b_ref[5:6, 0:128]
    bc3 = b_ref[6:7, 0:OUT_PAD]

    x = x_ref[...]                                                       # (N*P, 8) bf16

    # point_features[0]: Conv1d(k=1)+BN+ReLU, output padded to 128 lanes (64:128 zero)
    h1 = jnp.maximum(jnp.dot(x, w1_ref[...], preferred_element_type=f32) + b1, 0.0)
    h1b = h1.astype(bf16)

    # packed matmul 1: [w2 | wc1 rows for h1]  -> h2 (cols 0:128), c1 partial (128:384)
    p1 = jnp.dot(h1b, wp1_ref[...], preferred_element_type=f32)          # (N*P, 384)
    h2 = jnp.maximum(p1[:, 0:128] + b2, 0.0)
    c1 = p1[:, 128:384]
    h2b = h2.astype(bf16)

    # packed matmul 2: [w3 | wc1 rows for h2]  -> h3 (cols 0:256), c1 partial (256:512)
    p2 = jnp.dot(h2b, wp2_ref[...], preferred_element_type=f32)          # (N*P, 512)
    h3 = jnp.maximum(p2[:, 0:256] + b3, 0.0)
    c1 = c1 + p2[:, 256:512]
    h3b = h3.astype(bf16)

    # packed matmul 3: [wg | wc1 rows for h3]  -> global feat g (0:128), c1 partial (128:384)
    p3 = jnp.dot(h3b, wp3_ref[...], preferred_element_type=f32)          # (N*P, 384)
    g = p3[:, 0:128] + bg
    c1 = c1 + p3[:, 128:384] + bc1

    # Per-batch global max over points (the recursive MaxPool1d(8) stack reduces to a
    # global max under the module's constructor precondition), projected through the
    # last 128 rows of wc1 and broadcast back over each batch's points.
    gm = jnp.max(g.reshape(n_batch, n_points, 128), axis=1)              # (N, 128)
    proj = jnp.dot(gm.astype(bf16), wc1g_ref[...], preferred_element_type=f32)   # (N, 256)
    c1 = c1.reshape(n_batch, n_points, 256) + proj.reshape(n_batch, 1, 256)
    c1 = jnp.maximum(c1, 0.0).reshape(n_batch * n_points, 256)

    # classifier[1] and classifier[2] (final output padded to OUT_PAD lanes)
    c2 = jnp.maximum(jnp.dot(c1.astype(bf16), wc2_ref[...],
                             preferred_element_type=f32) + bc2, 0.0)
    out = jnp.dot(c2.astype(bf16), wc3_ref[...], preferred_element_type=f32) + bc3
    out_ref[...] = out.astype(out_ref.dtype)


def _check_pooling_precondition(num_points):
    """Mirror the module's pooling-stack construction asserts (recursive /8)."""
    assert num_points % 8 == 0, num_points
    rem = num_points
    while rem > 8:
        assert rem % 8 == 0, "number_points must be recursively divisible by 8"
        rem //= 8


def pointnet_forward(x, params):
    """x: (N, P, 3) float32 -> (N, num_seg_classes, P), matching the PyTorch module."""
    N, P, C = x.shape
    assert C == 3
    _check_pooling_precondition(P)   # guarantees the pooling stack == global max over points
    NP = N * P
    num_cls = params["wc3"].shape[1]

    weight_ops = pack_params(params, num_cls)
    x_pad = jnp.zeros((NP, 8), jnp.float32).at[:, :3].set(
        x.reshape(NP, 3)).astype(jnp.bfloat16)
    args = (x_pad,) + weight_ops

    flops = (2 * NP * (8 * 128 + 128 * 384 + 128 * 512 + 256 * 384
                       + 256 * 128 + 128 * OUT_PAD)
             + 2 * N * 128 * 256)
    bytes_accessed = sum(int(a.size) * a.dtype.itemsize for a in args) + NP * OUT_PAD * 4

    kernel = functools.partial(pointnet_seg_kernel, n_batch=N, n_points=P)

    out = pl.pallas_call(
        kernel,
        out_shape=jax.ShapeDtypeStruct((NP, OUT_PAD), jnp.float32),
        in_specs=[pl.BlockSpec(memory_space=pltpu.MemorySpace.VMEM) for _ in args],
        out_specs=pl.BlockSpec(memory_space=pltpu.MemorySpace.VMEM),
        cost_estimate=pl.CostEstimate(flops=flops, transcendentals=0,
                                      bytes_accessed=bytes_accessed),
    )(*args)

    out = out.reshape(N, P, OUT_PAD)[:, :, :num_cls]
    return jnp.transpose(out, (0, 2, 1))          # (N, num_seg_classes, num_points)


# ----------------------------------------------------------------------------
# Pure-JAX f32 reference (same folded parameters) for a sanity check.
# ----------------------------------------------------------------------------
def pointnet_reference(x, p):
    h1 = jax.nn.relu(x @ p["w1"] + p["b1"])
    h2 = jax.nn.relu(h1 @ p["w2"] + p["b2"])
    h3 = jax.nn.relu(h2 @ p["w3"] + p["b3"])
    g = h3 @ p["wg"] + p["bg"]
    gmax = jnp.max(g, axis=1, keepdims=True)                         # global max over points
    gmax = jnp.broadcast_to(gmax, g.shape)
    cat = jnp.concatenate([h1, h2, h3, gmax], axis=-1)               # (N, P, 576)
    c1 = jax.nn.relu(cat @ p["wc1"] + p["bc1"])
    c2 = jax.nn.relu(c1 @ p["wc2"] + p["bc2"])
    out = c2 @ p["wc3"] + p["bc3"]
    return jnp.transpose(out, (0, 2, 1))


if __name__ == "__main__":
    key = jax.random.PRNGKey(0)
    kx, kp = jax.random.split(key)
    x = jax.random.normal(kx, (BATCH, NUM_POINTS, 3), jnp.float32)
    params = make_params(kp, NUM_SEG_CLASSES)

    y = jax.block_until_ready(pointnet_forward(x, params))
    y_ref = jax.block_until_ready(pointnet_reference(x, params))

    assert y.shape == (BATCH, NUM_SEG_CLASSES, NUM_POINTS), y.shape
    max_err = float(jnp.max(jnp.abs(y - y_ref)))
    assert jnp.allclose(y, y_ref, rtol=5e-2, atol=5e-2), max_err

    print("KERNEL_OK")
</pallas_src>

<mosaic_0001>
module attributes {stable_mosaic.version = 11 : i64} {
  func.func @pointnet_seg_kernel(%arg0: memref<128x8xbf16, #tpu.memory_space<vmem>>, %arg1: memref<8x128xbf16, #tpu.memory_space<vmem>>, %arg2: memref<128x384xbf16, #tpu.memory_space<vmem>>, %arg3: memref<128x512xbf16, #tpu.memory_space<vmem>>, %arg4: memref<256x384xbf16, #tpu.memory_space<vmem>>, %arg5: memref<128x256xbf16, #tpu.memory_space<vmem>>, %arg6: memref<256x128xbf16, #tpu.memory_space<vmem>>, %arg7: memref<128x128xbf16, #tpu.memory_space<vmem>>, %arg8: memref<8x256xf32, #tpu.memory_space<vmem>>, %arg9: memref<128x128xf32, #tpu.memory_space<vmem>>) attributes {dimension_semantics = [], scalar_prefetch = 0 : i64, scratch_operands = 0 : i64, tpu.core_type = #tpu.core_type<tc>} {
    %c0 = arith.constant 0 : index
    %c0_0 = arith.constant 0 : index
    %0 = vector.load %arg8[%c0, %c0_0] : memref<8x256xf32, #tpu.memory_space<vmem>>, vector<1x128xf32>
    %c1 = arith.constant 1 : index
    %c0_1 = arith.constant 0 : index
    %1 = vector.load %arg8[%c1, %c0_1] : memref<8x256xf32, #tpu.memory_space<vmem>>, vector<1x128xf32>
    %c2 = arith.constant 2 : index
    %c0_2 = arith.constant 0 : index
    %2 = vector.load %arg8[%c2, %c0_2] : memref<8x256xf32, #tpu.memory_space<vmem>>, vector<1x256xf32>
    %c3 = arith.constant 3 : index
    %c0_3 = arith.constant 0 : index
    %3 = vector.load %arg8[%c3, %c0_3] : memref<8x256xf32, #tpu.memory_space<vmem>>, vector<1x128xf32>
    %c4 = arith.constant 4 : index
    %c0_4 = arith.constant 0 : index
    %4 = vector.load %arg8[%c4, %c0_4] : memref<8x256xf32, #tpu.memory_space<vmem>>, vector<1x256xf32>
    %c5 = arith.constant 5 : index
    %c0_5 = arith.constant 0 : index
    %5 = vector.load %arg8[%c5, %c0_5] : memref<8x256xf32, #tpu.memory_space<vmem>>, vector<1x128xf32>
    %c6 = arith.constant 6 : index
    %c0_6 = arith.constant 0 : index
    %6 = vector.load %arg8[%c6, %c0_6] : memref<8x256xf32, #tpu.memory_space<vmem>>, vector<1x128xf32>
    %c0_7 = arith.constant 0 : index
    %c0_8 = arith.constant 0 : index
    %7 = vector.load %arg0[%c0_7, %c0_8] : memref<128x8xbf16, #tpu.memory_space<vmem>>, vector<128x8xbf16>
    %c0_9 = arith.constant 0 : index
    %c0_10 = arith.constant 0 : index
    %8 = vector.load %arg1[%c0_9, %c0_10] : memref<8x128xbf16, #tpu.memory_space<vmem>>, vector<8x128xbf16>
    %cst = arith.constant dense<0.000000e+00> : vector<128x128xf32>
    %9 = tpu.matmul %7, %8, %cst {dimension_numbers = #tpu.dot_dimension_numbers<[1], [0], [0], [1], [0, 0, 1, 1], [], []>} : vector<128x8xbf16>, vector<8x128xbf16>, vector<128x128xf32> -> vector<128x128xf32>
    %10 = vector.broadcast %0 : vector<1x128xf32> to vector<128x128xf32>
    %11 = arith.addf %9, %10 : vector<128x128xf32>
    %cst_11 = arith.constant 0.000000e+00 : f32
    %12 = vector.broadcast %cst_11 : f32 to vector<128x128xf32>
    %13 = arith.maximumf %11, %12 : vector<128x128xf32>
    %14 = arith.truncf %13 : vector<128x128xf32> to vector<128x128xbf16>
    %c0_12 = arith.constant 0 : index
    %c0_13 = arith.constant 0 : index
    %15 = vector.load %arg2[%c0_12, %c0_13] : memref<128x384xbf16, #tpu.memory_space<vmem>>, vector<128x384xbf16>
    %cst_14 = arith.constant dense<0.000000e+00> : vector<128x384xf32>
    %16 = tpu.matmul %14, %15, %cst_14 {dimension_numbers = #tpu.dot_dimension_numbers<[1], [0], [0], [1], [0, 0, 1, 1], [], []>} : vector<128x128xbf16>, vector<128x384xbf16>, vector<128x384xf32> -> vector<128x384xf32>
    %17 = vector.extract_strided_slice %16 {offsets = [0, 0], sizes = [128, 128], strides = [1, 1]} : vector<128x384xf32> to vector<128x128xf32>
    %18 = vector.broadcast %1 : vector<1x128xf32> to vector<128x128xf32>
    %19 = arith.addf %17, %18 : vector<128x128xf32>
    %cst_15 = arith.constant 0.000000e+00 : f32
    %20 = vector.broadcast %cst_15 : f32 to vector<128x128xf32>
    %21 = arith.maximumf %19, %20 : vector<128x128xf32>
    %22 = vector.extract_strided_slice %16 {offsets = [0, 128], sizes = [128, 256], strides = [1, 1]} : vector<128x384xf32> to vector<128x256xf32>
    %23 = arith.truncf %21 : vector<128x128xf32> to vector<128x128xbf16>
    %c0_16 = arith.constant 0 : index
    %c0_17 = arith.constant 0 : index
    %24 = vector.load %arg3[%c0_16, %c0_17] : memref<128x512xbf16, #tpu.memory_space<vmem>>, vector<128x512xbf16>
    %cst_18 = arith.constant dense<0.000000e+00> : vector<128x512xf32>
    %25 = tpu.matmul %23, %24, %cst_18 {dimension_numbers = #tpu.dot_dimension_numbers<[1], [0], [0], [1], [0, 0, 1, 1], [], []>} : vector<128x128xbf16>, vector<128x512xbf16>, vector<128x512xf32> -> vector<128x512xf32>
    %26 = vector.extract_strided_slice %25 {offsets = [0, 0], sizes = [128, 256], strides = [1, 1]} : vector<128x512xf32> to vector<128x256xf32>
    %27 = vector.broadcast %2 : vector<1x256xf32> to vector<128x256xf32>
    %28 = arith.addf %26, %27 : vector<128x256xf32>
    %cst_19 = arith.constant 0.000000e+00 : f32
    %29 = vector.broadcast %cst_19 : f32 to vector<128x256xf32>
    %30 = arith.maximumf %28, %29 : vector<128x256xf32>
    %31 = vector.extract_strided_slice %25 {offsets = [0, 256], sizes = [128, 256], strides = [1, 1]} : vector<128x512xf32> to vector<128x256xf32>
    %32 = arith.addf %22, %31 : vector<128x256xf32>
    %33 = arith.truncf %30 : vector<128x256xf32> to vector<128x256xbf16>
    %c0_20 = arith.constant 0 : index
    %c0_21 = arith.constant 0 : index
    %34 = vector.load %arg4[%c0_20, %c0_21] : memref<256x384xbf16, #tpu.memory_space<vmem>>, vector<256x384xbf16>
    %cst_22 = arith.constant dense<0.000000e+00> : vector<128x384xf32>
    %35 = tpu.matmul %33, %34, %cst_22 {dimension_numbers = #tpu.dot_dimension_numbers<[1], [0], [0], [1], [0, 0, 1, 1], [], []>} : vector<128x256xbf16>, vector<256x384xbf16>, vector<128x384xf32> -> vector<128x384xf32>
    %36 = vector.extract_strided_slice %35 {offsets = [0, 0], sizes = [128, 128], strides = [1, 1]} : vector<128x384xf32> to vector<128x128xf32>
    %37 = vector.broadcast %3 : vector<1x128xf32> to vector<128x128xf32>
    %38 = arith.addf %36, %37 : vector<128x128xf32>
    %39 = vector.extract_strided_slice %35 {offsets = [0, 128], sizes = [128, 256], strides = [1, 1]} : vector<128x384xf32> to vector<128x256xf32>
    %40 = arith.addf %32, %39 : vector<128x256xf32>
    %41 = vector.broadcast %4 : vector<1x256xf32> to vector<128x256xf32>
    %42 = arith.addf %40, %41 : vector<128x256xf32>
    %43 = vector.shape_cast %38 : vector<128x128xf32> to vector<2x64x128xf32>
    %cst_23 = arith.constant dense<0xFF800000> : vector<2x128xf32>
    %44 = vector.multi_reduction <maximumf>, %43, %cst_23 [1] : vector<2x64x128xf32> to vector<2x128xf32>
    %45 = arith.truncf %44 : vector<2x128xf32> to vector<2x128xbf16>
    %c0_24 = arith.constant 0 : index
    %c0_25 = arith.constant 0 : index
    %46 = vector.load %arg5[%c0_24, %c0_25] : memref<128x256xbf16, #tpu.memory_space<vmem>>, vector<128x256xbf16>
    %cst_26 = arith.constant dense<0.000000e+00> : vector<2x256xf32>
    %47 = tpu.matmul %45, %46, %cst_26 {dimension_numbers = #tpu.dot_dimension_numbers<[1], [0], [0], [1], [0, 0, 1, 1], [], []>} : vector<2x128xbf16>, vector<128x256xbf16>, vector<2x256xf32> -> vector<2x256xf32>
    %48 = vector.shape_cast %42 : vector<128x256xf32> to vector<2x64x256xf32>
    %49 = vector.shape_cast %47 : vector<2x256xf32> to vector<2x1x256xf32>
    %50 = vector.broadcast %49 : vector<2x1x256xf32> to vector<2x64x256xf32>
    %51 = arith.addf %48, %50 : vector<2x64x256xf32>
    %cst_27 = arith.constant 0.000000e+00 : f32
    %52 = vector.broadcast %cst_27 : f32 to vector<2x64x256xf32>
    %53 = arith.maximumf %51, %52 : vector<2x64x256xf32>
    %54 = vector.shape_cast %53 : vector<2x64x256xf32> to vector<128x256xf32>
    %55 = arith.truncf %54 : vector<128x256xf32> to vector<128x256xbf16>
    %c0_28 = arith.constant 0 : index
    %c0_29 = arith.constant 0 : index
    %56 = vector.load %arg6[%c0_28, %c0_29] : memref<256x128xbf16, #tpu.memory_space<vmem>>, vector<256x128xbf16>
    %cst_30 = arith.constant dense<0.000000e+00> : vector<128x128xf32>
    %57 = tpu.matmul %55, %56, %cst_30 {dimension_numbers = #tpu.dot_dimension_numbers<[1], [0], [0], [1], [0, 0, 1, 1], [], []>} : vector<128x256xbf16>, vector<256x128xbf16>, vector<128x128xf32> -> vector<128x128xf32>
    %58 = vector.broadcast %5 : vector<1x128xf32> to vector<128x128xf32>
    %59 = arith.addf %57, %58 : vector<128x128xf32>
    %cst_31 = arith.constant 0.000000e+00 : f32
    %60 = vector.broadcast %cst_31 : f32 to vector<128x128xf32>
    %61 = arith.maximumf %59, %60 : vector<128x128xf32>
    %62 = arith.truncf %61 : vector<128x128xf32> to vector<128x128xbf16>
    %c0_32 = arith.constant 0 : index
    %c0_33 = arith.constant 0 : index
    %63 = vector.load %arg7[%c0_32, %c0_33] : memref<128x128xbf16, #tpu.memory_space<vmem>>, vector<128x128xbf16>
    %cst_34 = arith.constant dense<0.000000e+00> : vector<128x128xf32>
    %64 = tpu.matmul %62, %63, %cst_34 {dimension_numbers = #tpu.dot_dimension_numbers<[1], [0], [0], [1], [0, 0, 1, 1], [], []>} : vector<128x128xbf16>, vector<128x128xbf16>, vector<128x128xf32> -> vector<128x128xf32>
    %65 = vector.broadcast %6 : vector<1x128xf32> to vector<128x128xf32>
    %66 = arith.addf %64, %65 : vector<128x128xf32>
    %c0_35 = arith.constant 0 : index
    %c0_36 = arith.constant 0 : index
    %67 = vector.load %arg9[%c0_35, %c0_36] : memref<128x128xf32, #tpu.memory_space<vmem>>, vector<128x128xf32>
    tpu.vector_store %arg9[%c0_35, %c0_36], %66 {strides = array<i32>} : memref<128x128xf32, #tpu.memory_space<vmem>>, vector<128x128xf32>,
    return
  }
}

</mosaic_0001>

<bundles_post_ra>
// kernel: tpu_custom_call.1
= control target key start
LH: loop header
LB: loop body
LE: loop exit
PB: predicated region body
PF: predicated region fallthrough
CT: control target
= control target key end

     0   :  { %14 = vsyncpa [#allocation3], 0  ;;  %s4131_s0 = inlined_call_operand.vmem [shape: bf16[128,8], index: 0, kind: input, shape index: {}]   ;;  %s4132_s1 = inlined_call_operand.vmem [shape: bf16[8,128], index: 1, kind: input, shape index: {}]   ;;  %s4133_s2 = inlined_call_operand.hbm [shape: bf16[128,384], index: 2, kind: input, shape index: {}]   ;;  %s4134_s3 = inlined_call_operand.hbm [shape: bf16[128,512], index: 3, kind: input, shape index: {}]   ;;  %s4135_s4 = inlined_call_operand.hbm [shape: bf16[256,384], index: 4, kind: input, shape index: {}]   ;;  %s4136_s5 = inlined_call_operand.hbm [shape: bf16[128,256], index: 5, kind: input, shape index: {}]   ;;  %s4137_s6 = inlined_call_operand.hbm [shape: bf16[256,128], index: 6, kind: input, shape index: {}]   ;;  %s4138_s7 = inlined_call_operand.vmem [shape: bf16[128,128], index: 7, kind: input, shape index: {}]   ;;  %s4139_s8 = inlined_call_operand.vmem [shape: f32[8,256], index: 8, kind: input, shape index: {}]   ;;  %s4140_s9 = inlined_call_operand.hbm [shape: f32[128,128], index: 9, kind: output, shape index: {}]  }
   0x1   :  { %15 = vsyncpa [#allocation6], 0 }
   0x2   :  { %16 = vsyncpa [#allocation9], 0 }
   0x3   :  { %17 = vsyncpa [#allocation4], 0  ;;  %s3403_s30 = smov [#allocation5]   ;;  %s3263_s13 = scalar_lea.hbm %s4134_s3, 4096 }
   0x4   :  { %s39_s10 = sshll.u32 %s3403_s30, 4  ;;  %p3264_p0 = scmp.ne.s32.totalorder %s4134_s3, %s3263_s13  ;;  %s40_s10 = int_to_ptr.vmem [resolvable:$true] %s39_s10 }
   0x5   :  { %p3267_p1 = scmp.lt.u32.totalorder %s3263_s13, %s4134_s3 }
   0x7   :  { %p3269_p2 = pnand %p3267_p1, %p3264_p0 }
   0x9   :  { %3272 = shalt.err (!%p3269_p2)
}
   0xa   :  { %s3273_s18 = scalar_lea.vmem %s40_s10, 4096  ;;  %p3278_p4 = scmp.lt.s32.totalorder %s40_s10, %s40_s10 }
   0xb   :  { %p3274_p3 = scmp.ne.s32.totalorder %s40_s10, %s3273_s18  ;;  %p3279_p5 = scmp.lt.s32.totalorder %s3273_s18, %s3273_s18 }
   0xd   :  { %p3280_p6 = por %p3279_p5, %p3278_p4 }
   0xf   :  { %p3281_p7 = pnand %p3280_p6, %p3274_p3 }
  0x11   :  { %3284 = shalt.err (!%p3281_p7)
}
  0x12   :  { %s3404_s19 = smov 256   ;;  %s3405_s20 = smov 16  }
  0x13   :  { %45 = dma.hbm_to_vmem [thread:$0]  %s4134_s3, 4096, %s40_s10, [#allocation6], %s3404_s19, %s3404_s19, %s3405_s20  }
  0x14   :  { %s3406_s23 = smov [#allocation8]   ;;  %s3285_s27 = scalar_lea.hbm %s4136_s5, 2048 }
  0x15   :  { %s63_s24 = sshll.u32 %s3406_s23, 4  ;;  %p3286_p8 = scmp.ne.s32.totalorder %s4136_s5, %s3285_s27  ;;  %s64_s24 = int_to_ptr.vmem [resolvable:$true] %s63_s24 }
  0x16   :  { %p3289_p9 = scmp.lt.u32.totalorder %s3285_s27, %s4136_s5 }
  0x18   :  { %p3291_p10 = pnand %p3289_p9, %p3286_p8 }
  0x1a   :  { %3294 = shalt.err (!%p3291_p10)
}
  0x1b   :  { %s3295_s12 = scalar_lea.vmem %s64_s24, 2048  ;;  %p3300_p12 = scmp.lt.s32.totalorder %s64_s24, %s64_s24 }
  0x1c   :  { %p3296_p11 = scmp.ne.s32.totalorder %s64_s24, %s3295_s12  ;;  %p3301_p13 = scmp.lt.s32.totalorder %s3295_s12, %s3295_s12 }
  0x1e   :  { %p3302_p0 = por %p3301_p13, %p3300_p12 }
  0x20   :  { %p3303_p1 = pnand %p3302_p0, %p3296_p11 }
  0x22   :  { %3306 = shalt.err (!%p3303_p1)
}
  0x23   :  { %s3407_s3 = smov 128   ;;  %s3408_s10 = smov 8  }
  0x24   :  { %69 = dma.hbm_to_vmem [thread:$0]  %s4136_s5, 2048, %s64_s24, [#allocation9], %s3407_s3, %s3407_s3, %s3408_s10  }
  0x25   :  { %s3409_s15 = smov [#allocation2]   ;;  %s3307_s19 = scalar_lea.hbm %s4133_s2, 3072 }
  0x26   :  { %s27_s16 = sshll.u32 %s3409_s15, 4  ;;  %p3308_p2 = scmp.ne.s32.totalorder %s4133_s2, %s3307_s19  ;;  %s28_s16 = int_to_ptr.vmem [resolvable:$true] %s27_s16 }
  0x27   :  { %p3311_p3 = scmp.lt.u32.totalorder %s3307_s19, %s4133_s2 }
  0x29   :  { %p3313_p4 = pnand %p3311_p3, %p3308_p2 }
  0x2b   :  { %3316 = shalt.err (!%p3313_p4)
}
  0x2c   :  { %s3317_s25 = scalar_lea.vmem %s28_s16, 3072  ;;  %p3322_p6 = scmp.lt.s32.totalorder %s28_s16, %s28_s16 }
  0x2d   :  { %p3318_p5 = scmp.ne.s32.totalorder %s28_s16, %s3317_s25  ;;  %p3323_p7 = scmp.lt.s32.totalorder %s3317_s25, %s3317_s25 }
  0x2f   :  { %p3324_p8 = por %p3323_p7, %p3322_p6 }
  0x31   :  { %p3325_p9 = pnand %p3324_p8, %p3318_p5 }
  0x33   :  { %3328 = shalt.err (!%p3325_p9)
}
  0x34   :  { %s3410_s5 = smov 192   ;;  %s3411_s24 = smov 12  }
  0x35   :  { %33 = dma.hbm_to_vmem [thread:$0]  %s4133_s2, 3072, %s28_s16, [#allocation3], %s3410_s5, %s3410_s5, %s3411_s24  }
  0x36   :  { %s3412_s28 = smov [#allocation7]   ;;  %s3413_s30 = smov [#allocation10]  }
  0x37   :  { %s51_s29 = sshll.u32 %s3412_s28, 4  ;;  %s75_s11 = sshll.u32 %s3413_s30, 4  ;;  %s52_s29 = int_to_ptr.vmem [resolvable:$true] %s51_s29  ;;  %s76_s11 = int_to_ptr.vmem [resolvable:$true] %s75_s11 }
  0x38   :  { %s3329_s14 = scalar_lea.hbm %s4135_s4, 6144 }
  0x39   :  { %p3330_p10 = scmp.ne.s32.totalorder %s4135_s4, %s3329_s14  ;;  %p3333_p11 = scmp.lt.u32.totalorder %s3329_s14, %s4135_s4 }
  0x3b   :  { %p3335_p12 = pnand %p3333_p11, %p3330_p10 }
  0x3d   :  { %3338 = shalt.err (!%p3335_p12)
}
  0x3e   :  { %s3339_s2 = scalar_lea.vmem %s52_s29, 6144  ;;  %p3344_p0 = scmp.lt.s32.totalorder %s52_s29, %s52_s29 }
  0x3f   :  { %p3340_p13 = scmp.ne.s32.totalorder %s52_s29, %s3339_s2  ;;  %p3345_p1 = scmp.lt.s32.totalorder %s3339_s2, %s3339_s2 }
  0x41   :  { %p3346_p2 = por %p3345_p1, %p3344_p0 }
  0x43   :  { %p3347_p3 = pnand %p3346_p2, %p3340_p13 }
  0x45   :  { %3350 = shalt.err (!%p3347_p3)
}
  0x46   :  { %57 = dma.hbm_to_vmem [thread:$0]  %s4135_s4, 6144, %s52_s29, [#allocation6], %s3410_s5, %s3410_s5, %s3411_s24  }
  0x47   :  { %s3351_s23 = scalar_lea.hbm %s4137_s6, 2048 }
  0x48   :  { %p3352_p4 = scmp.ne.s32.totalorder %s4137_s6, %s3351_s23  ;;  %p3355_p5 = scmp.lt.u32.totalorder %s3351_s23, %s4137_s6 }
  0x4a   :  { %p3357_p6 = pnand %p3355_p5, %p3352_p4 }
  0x4c   :  { %3360 = shalt.err (!%p3357_p6)
}
  0x4d   :  { %s3361_s30 = scalar_lea.vmem %s76_s11, 2048  ;;  %p3366_p8 = scmp.lt.s32.totalorder %s76_s11, %s76_s11 }
  0x4e   :  { %p3362_p7 = scmp.ne.s32.totalorder %s76_s11, %s3361_s30  ;;  %p3367_p9 = scmp.lt.s32.totalorder %s3361_s30, %s3361_s30 }
  0x50   :  { %p3368_p10 = por %p3367_p9, %p3366_p8 }
  0x52   :  { %p3369_p11 = pnand %p3368_p10, %p3362_p7 }
  0x54   :  { %3372 = shalt.err (!%p3369_p11)
}
  0x55   :  { %s3414_s4 = smov 64   ;;  %s3415_s5 = smov 4  }
  0x56   :  { %81 = dma.hbm_to_vmem [thread:$0]  %s4137_s6, 2048, %s76_s11, [#allocation9], %s3414_s4, %s3414_s4, %s3415_s5  }
  0x57   :  { %3395 = dma.done.wait [#allocation3], 3072  }
  0x58   :  { %3396 = vsyncadd [#allocation3], 4294964224 }
  0x59   :  { %3397 = dma.done.wait [#allocation6], 10240  }
  0x5a   :  { %3398 = vsyncadd [#allocation6], 4294957056 }
  0x5b   :  { %3399 = dma.done.wait [#allocation9], 4096  }
  0x5c   :  { %3400 = vsyncadd [#allocation9], 4294963200  ;;  %vm193_vm0 = vcmask 1043456   ;;  %vm168_vm1 = vcmask 64512   ;;  %v127_v0 = vld [vmem:[%s4132_s1] sm:$0xf] }
  0x5d   :  { %3046 = vmatprep.subr.msk.bf16.mxu0 %vm193_vm0, %v127_v0  ;;  %v195_v1 = vsel %vm193_vm0, %v127_v0, 0  ;;  %v3063_v2 = vld [vmem:[%s4131_s0] sm:$0xff]   ;;  %v3064_v3 = vld [vmem:[%s4131_s0 + $0x8] sm:$0xff]   ;;  %v3065_v4 = vld [vmem:[%s4131_s0 + $0x10] sm:$0xff]   ;;  %v3416_v34 = vmov 0   ;;  %vm1938_vm2 = vcmask 1041409  }
  0x5e   :  { %2965 = vmatpush3.bf16.msra.mxu0 %v195_v1  ;;  %2966 = vmatprep.mubr.msk.bf16.mxu0 %vm168_vm1, %v3063_v2  ;;  %v3066_v5 = vld [vmem:[%s4131_s0 + $0x18] sm:$0xff]   ;;  %v3067_v6 = vld [vmem:[%s4131_s0 + $0x20] sm:$0xff]   ;;  %v3068_v15 = vld [vmem:[%s4131_s0 + $0x28] sm:$0xff]  }
  0x5f   :  { %v3071_v7 = vld [vmem:[#allocation2 + $0x4] ss:$12 sps:$4 sm:$0xff]   ;;  %v3073_v8 = vld [vmem:[#allocation2] ss:$12 sps:$4 sm:$0xff]   ;;  %v3074_v9 = vld [vmem:[#allocation2 + $0x8] ss:$12 sps:$4 sm:$0xff]   ;;  %510 = vmatprep.mubr.bf16.mxu1 %v3416_v34 }
  0x60   :  { %478 = vmatprep.subr.bf16.mxu1 %v3071_v7  ;;  %v3075_v10 = vld [vmem:[#allocation2 + $0x1c] ss:$12 sps:$4 sm:$0xff]   ;;  %v3077_v11 = vld [vmem:[#allocation2 + $0x18] ss:$12 sps:$4 sm:$0xff]   ;;  %2982 = vmatprep.subr.bf16.mxu0 %v3074_v9  ;;  %v3078_v12 = vld [vmem:[#allocation2 + $0x20] ss:$12 sps:$4 sm:$0xff]  }
  0x61   :  { %2967 = vmatmul.mubr.msk.bf16.vlgmr.msra.gmra.mrb[0].mxu0 %vm168_vm1, %v3064_v3  ;;  %479 = vmatpush1.bf16.msra.mxu1 %v3073_v8  ;;  %v3079_v13 = vld [vmem:[#allocation2 + $0x34] ss:$12 sps:$4 sm:$0xff]   ;;  %v3082_v14 = vld [vmem:[#allocation2 + $0x38] ss:$12 sps:$4 sm:$0xff]   ;;  %v3081_v16 = vld [vmem:[#allocation2 + $0x30] ss:$12 sps:$4 sm:$0xff]  }
  0x62   :  { %2970 = vmatprep.mubr.msk.bf16.mxu0 %vm168_vm1, %v3065_v4  ;;  %480 = vmatprep.subr.bf16.mxu1 %v3075_v10  ;;  %v3083_v17 = vld [vmem:[#allocation2 + $0x4c] ss:$12 sps:$4 sm:$0xff]   ;;  %v3086_v19 = vld [vmem:[#allocation2 + $0x50] ss:$12 sps:$4 sm:$0xff]   ;;  %v3085_v20 = vld [vmem:[#allocation2 + $0x48] ss:$12 sps:$4 sm:$0xff]  }
  0x63   :  { %2983 = vmatpush3.bf16.msra.mxu0 %v3074_v9  ;;  %v3069_v18 = vld [vmem:[%s4131_s0 + $0x30] sm:$0xff]   ;;  %v3087_v21 = vld [vmem:[#allocation2 + $0x64] ss:$12 sps:$4 sm:$0xff]   ;;  %v3089_v22 = vld [vmem:[#allocation2 + $0x60] ss:$12 sps:$4 sm:$0xff]  }
  0x64   :  { %2984 = vmatprep.subr.bf16.mxu0 %v3078_v12  ;;  %v3090_v23 = vld [vmem:[#allocation2 + $0x68] ss:$12 sps:$4 sm:$0xff]   ;;  %v3070_v24 = vld [vmem:[%s4131_s0 + $0x38] sm:$0xff]   ;;  %v3097_v29 = vld [vmem:[#allocation2 + $0x90] ss:$12 sps:$4 sm:$0xff]  }
  0x65   :  { %481 = vmatpush1.bf16.msra.mxu1 %v3077_v11  ;;  %v3091_v25 = vld [vmem:[#allocation2 + $0x7c] ss:$12 sps:$4 sm:$0xff]   ;;  %v3094_v26 = vld [vmem:[#allocation2 + $0x80] ss:$12 sps:$4 sm:$0xff]   ;;  %v3093_v27 = vld [vmem:[#allocation2 + $0x78] ss:$12 sps:$4 sm:$0xff]  }
  0x66   :  { %482 = vmatprep.subr.bf16.mxu1 %v3079_v13  ;;  %v3095_v28 = vld [vmem:[#allocation2 + $0x94] ss:$12 sps:$4 sm:$0xff]   ;;  %v3098_v30 = vld [vmem:[#allocation2 + $0x98] ss:$12 sps:$4 sm:$0xff]   ;;  %v3102_v33 = vld [vmem:[#allocation2 + $0xb0] ss:$12 sps:$4 sm:$0xff]  }
  0x67   :  { %2985 = vmatpush3.bf16.msra.mxu0 %v3078_v12  ;;  %v3099_v31 = vld [vmem:[#allocation2 + $0xac] ss:$12 sps:$4 sm:$0xff]   ;;  %v3101_v32 = vld [vmem:[#allocation2 + $0xa8] ss:$12 sps:$4 sm:$0xff]   ;;  %v3103_v53 = vld [vmem:[#allocation5] ss:$16 sps:$4 sm:$0xff]  }
  0x68   :  { %2986 = vmatprep.subr.bf16.mxu0 %v3082_v14  ;;  %v3105_v35 = vld [vmem:[#allocation5 + $0x4] ss:$16 sps:$4 sm:$0xff]   ;;  %v3108_v36 = vld [vmem:[#allocation5 + $0xc] ss:$16 sps:$4 sm:$0xff]   ;;  %v3571_v37 = vld [vmem:[%s4139_s8] ss:$0 sm:$0xff] }
  0x69   :  { %2971 = vmatmul.mubr.msk.bf16.gmra.mrb[4].mxu0 %vm168_vm1, %v3066_v5  ;;  %483 = vmatpush1.bf16.msra.mxu1 %v3081_v16  ;;  %v3106_v54 = vld [vmem:[#allocation5 + $0x8] ss:$16 sps:$4 sm:$0xff]   ;;  %v3111_v57 = vld [vmem:[#allocation5 + $0x24] ss:$16 sps:$4 sm:$0xff]   ;;  %v3114_v58 = vld [vmem:[#allocation5 + $0x2c] ss:$16 sps:$4 sm:$0xff]  }
  0x6a   :  { %2974 = vmatprep.mubr.msk.bf16.mxu0 %vm168_vm1, %v3067_v6  ;;  %484 = vmatprep.subr.bf16.mxu1 %v3083_v17  ;;  %v3109_v2 = vld [vmem:[#allocation5 + $0x20] ss:$16 sps:$4 sm:$0xff]   ;;  %v3112_v3 = vld [vmem:[#allocation5 + $0x28] ss:$16 sps:$4 sm:$0xff]   ;;  %v3117_v5 = vld [vmem:[#allocation5 + $0x44] ss:$16 sps:$4 sm:$0xff]  }
  0x6b   :  { %2987 = vmatpush3.bf16.msra.mxu0 %v3082_v14  ;;  %v3120_v6 = vld [vmem:[#allocation5 + $0x4c] ss:$16 sps:$4 sm:$0xff]   ;;  %v3115_v11 = vld [vmem:[#allocation5 + $0x40] ss:$16 sps:$4 sm:$0xff]   ;;  %v3118_v12 = vld [vmem:[#allocation5 + $0x48] ss:$16 sps:$4 sm:$0xff]  }
  0x6c   :  { %2988 = vmatprep.subr.bf16.mxu0 %v3086_v19  ;;  %v3126_v16 = vld [vmem:[#allocation5 + $0x6c] ss:$16 sps:$4 sm:$0xff]  }
  0x6d   :  { %485 = vmatpush1.bf16.msra.mxu1 %v3085_v20 }
  0x6e   :  { %486 = vmatprep.subr.bf16.mxu1 %v3087_v21 }
  0x6f   :  { %2989 = vmatpush3.bf16.msra.mxu0 %v3086_v19 }
  0x70   :  { %2990 = vmatprep.subr.bf16.mxu0 %v3090_v23 }
  0x71   :  { %2975 = vmatmul.mubr.msk.bf16.gmra.mrb[8].mxu0 %vm168_vm1, %v3068_v15  ;;  %487 = vmatpush1.bf16.msra.mxu1 %v3089_v22  ;;  %v3123_v15 = vld [vmem:[#allocation5 + $0x64] ss:$16 sps:$4 sm:$0xff]  }
  0x72   :  { %2978 = vmatprep.mubr.msk.bf16.mxu0 %vm168_vm1, %v3069_v18  ;;  %488 = vmatprep.subr.bf16.mxu1 %v3091_v25  ;;  %v3124_v25 = vld [vmem:[#allocation5 + $0x68] ss:$16 sps:$4 sm:$0xff]  }
  0x73   :  { %2991 = vmatpush3.bf16.msra.mxu0 %v3090_v23 }
  0x74   :  { %2992 = vmatprep.subr.bf16.mxu0 %v3094_v26 }
  0x75   :  { %489 = vmatpush1.bf16.msra.mxu1 %v3093_v27  ;;  %v3129_v27 = vld [vmem:[#allocation5 + $0x84] ss:$16 sps:$4 sm:$0xff]  }
  0x76   :  { %490 = vmatprep.subr.bf16.mxu1 %v3095_v28  ;;  %v3132_v28 = vld [vmem:[#allocation5 + $0x8c] ss:$16 sps:$4 sm:$0xff]  }
  0x77   :  { %2993 = vmatpush3.bf16.msra.mxu0 %v3094_v26 }
  0x78   :  { %2994 = vmatprep.subr.bf16.mxu0 %v3098_v30 }
  0x79   :  { %2979 = vmatmul.mubr.msk.bf16.gmra.mrb[12].mxu0 %vm168_vm1, %v3070_v24  ;;  %491 = vmatpush1.bf16.msra.mxu1 %v3097_v29  ;;  %v3121_v24 = vld [vmem:[#allocation5 + $0x60] ss:$16 sps:$4 sm:$0xff]  }
  0x7a   :  { %492 = vmatprep.subr.bf16.mxu1 %v3099_v31 }
  0x7b   :  { %2995 = vmatpush3.bf16.msra.mxu0 %v3098_v30 }
  0x7c   :  { %2996 = vmatprep.subr.bf16.mxu0 %v3102_v33 }
  0x7d   :  { %493 = vmatpush1.bf16.msra.mxu1 %v3101_v32 }
  0x7e   :  { %1033 = vmatprep.subr.bf16.mxu1 %v3108_v36 }
  0x7f   :  { %2997 = vmatpush3.bf16.msra.mxu0 %v3102_v33  ;;  %v3127_v33 = vld [vmem:[#allocation5 + $0x80] ss:$16 sps:$4 sm:$0xff]  }
  0x80   :  { %920 = vmatprep.subr.bf16.mxu0 %v3105_v35  ;;  %v3130_v35 = vld [vmem:[#allocation5 + $0x88] ss:$16 sps:$4 sm:$0xff]  }
 0x134   :  { %v2968_v38 = vpop.f32.mrb[0].mxu0 }
 0x135   :  { %v240_v39 = vadd.f32 %v2968_v38, %v3571_v37  ;;  %v231_v40 = vpop.f32.mrb[1].mxu0 }
 0x136   :  { %v232_v41 = vadd.f32 %v231_v40, %v3571_v37  ;;  %v2969_v42 = vpop.f32.mrb[2].mxu0  ;;  %v3138_v40 = vld [vmem:[#allocation5 + $0xac] ss:$16 sps:$4 sm:$0xff]  }
 0x137   :  { %v243_v43 = vadd.f32 %v2969_v42, %v3571_v37  ;;  %v234_v44 = vpop.f32.mrb[3].mxu0  ;;  %v296_v46 = vmax.f32 %v240_v39, 0.0  ;;  %v3135_v39 = vld [vmem:[#allocation5 + $0xa4] ss:$16 sps:$4 sm:$0xff]  }
 0x138   :  { %v235_v45 = vadd.f32 %v234_v44, %v3571_v37  ;;  %v294_v48 = vmax.f32 %v232_v41, 0.0 }
 0x139   :  { %v297_v47 = vmax.f32 %v243_v43, 0.0 }
 0x13a   :  { %v295_v49 = vmax.f32 %v235_v45, 0.0 }
 0x13b   :  { %v311_v50 = vpack.c.bf16 %v297_v47, %v296_v46 }
 0x13c   :  { %v310_v51 = vpack.c.bf16 %v295_v49, %v294_v48  ;;  %v2972_v52 = vpop.f32.mrb[4].mxu0  ;;  %v3133_v48 = vld [vmem:[#allocation5 + $0xa0] ss:$16 sps:$4 sm:$0xff]   ;;  %v3136_v49 = vld [vmem:[#allocation5 + $0xa8] ss:$16 sps:$4 sm:$0xff]  }
 0x13d   :  { %v256_v55 = vadd.f32 %v2972_v52, %v3571_v37  ;;  %v247_v56 = vpop.f32.mrb[5].mxu0 }
 0x13e   :  { %v248_v59 = vadd.f32 %v247_v56, %v3571_v37  ;;  %511 = vmatmul.mubr.bf16.vlgmr.msra.gmra.mrb[0].mxu1 %v310_v51  ;;  %2998 = vmatprep.mubr.bf16.mxu0 %v310_v51  ;;  %v2973_v60 = vpop.f32.mrb[6].mxu0  ;;  %v3142_v56 = vld [vmem:[#allocation5 + $0xc8] ss:$16 sps:$4 sm:$0xff]  }
 0x13f   :  { %v300_v61 = vmax.f32 %v256_v55, 0.0  ;;  %v259_v62 = vadd.f32 %v2973_v60, %v3571_v37  ;;  %2999 = vmatmul.mubr.bf16.vlgmr.msra.gmra.mrb[16].mxu0 %v311_v50  ;;  %v250_v63 = vpop.f32.mrb[7].mxu0  ;;  %520 = vmatprep.mubr.bf16.mxu1 %v3416_v34  ;;  %v3139_v55 = vld [vmem:[#allocation5 + $0xc0] ss:$16 sps:$4 sm:$0xff]   ;;  %v3148_v60 = vld [vmem:[#allocation5 + $0xe8] ss:$16 sps:$4 sm:$0xff]  }
 0x140   :  { %v298_v0 = vmax.f32 %v248_v59, 0.0  ;;  %v251_v1 = vadd.f32 %v250_v63, %v3571_v37  ;;  %921 = vmatpush1.bf16.msra.mxu0 %v3103_v53  ;;  %1034 = vmatpush1.bf16.msra.mxu1 %v3106_v54  ;;  %v3144_v54 = vld [vmem:[#allocation5 + $0xcc] ss:$16 sps:$4 sm:$0xff]   ;;  %v3145_v59 = vld [vmem:[#allocation5 + $0xe0] ss:$16 sps:$4 sm:$0xff]  }
 0x141   :  { %v301_v4 = vmax.f32 %v259_v62, 0.0  ;;  %922 = vmatprep.subr.bf16.mxu0 %v3111_v57  ;;  %1035 = vmatprep.subr.bf16.mxu1 %v3114_v58  ;;  %v3147_v57 = vld [vmem:[#allocation5 + $0xe4] ss:$16 sps:$4 sm:$0xff]   ;;  %v3150_v58 = vld [vmem:[#allocation5 + $0xec] ss:$16 sps:$4 sm:$0xff]  }
 0x142   :  { %v299_v7 = vmax.f32 %v251_v1, 0.0  ;;  %v3178_v62 = vld [vmem:[#allocation7 + $0xc8] ss:$12 sps:$4 sm:$0xff]  }
 0x143   :  { %v3582_v8 = vpack.c.bf16 %v301_v4, %v300_v61  ;;  %v3153_v61 = vld [vmem:[#allocation7 + $0x4] ss:$12 sps:$4 sm:$0xff]   ;;  %v3605_v63 = vld [vmem:[%s4139_s8 + $0x1] ss:$0 sm:$0xff] }
 0x144   :  { %v312_v9 = vpack.c.bf16 %v299_v7, %v298_v0  ;;  %v2976_v10 = vpop.f32.mrb[8].mxu0  ;;  %923 = vmatpush1.bf16.msra.mxu0 %v3109_v2  ;;  %1036 = vmatpush1.bf16.msra.mxu1 %v3112_v3 }
 0x145   :  { %v272_v13 = vadd.f32 %v2976_v10, %v3571_v37  ;;  %v263_v14 = vpop.f32.mrb[9].mxu0  ;;  %924 = vmatprep.subr.bf16.mxu0 %v3117_v5  ;;  %1037 = vmatprep.subr.bf16.mxu1 %v3120_v6 }
 0x146   :  { %521 = vmatmul.mubr.bf16.gmra.mrb[4].mxu1 %v311_v50  ;;  %3002 = vmatprep.mubr.bf16.mxu0 %v312_v9  ;;  %v264_v17 = vadd.f32 %v263_v14, %v3571_v37  ;;  %v2977_v18 = vpop.f32.mrb[10].mxu0  ;;  %v3179_v14 = vld [vmem:[#allocation7 + $0x8] ss:$12 sps:$4 sm:$0xff]  }
 0x147   :  { %3003 = vmatmul.mubr.bf16.gmra.mrb[20].mxu0 %v3582_v8  ;;  %v304_v19 = vmax.f32 %v272_v13, 0.0  ;;  %530 = vmatprep.mubr.bf16.mxu1 %v3416_v34  ;;  %v275_v20 = vadd.f32 %v2977_v18, %v3571_v37  ;;  %v266_v21 = vpop.f32.mrb[11].mxu0  ;;  %v3151_v13 = vld [vmem:[#allocation7] ss:$12 sps:$4 sm:$0xff]  }
 0x148   :  { %v302_v22 = vmax.f32 %v264_v17, 0.0  ;;  %v267_v23 = vadd.f32 %v266_v21, %v3571_v37  ;;  %925 = vmatpush1.bf16.msra.mxu0 %v3115_v11  ;;  %1038 = vmatpush1.bf16.msra.mxu1 %v3118_v12  ;;  %v3183_v17 = vld [vmem:[#allocation7 + $0xe0] ss:$12 sps:$4 sm:$0xff]  }
 0x149   :  { %v305_v26 = vmax.f32 %v275_v20, 0.0  ;;  %926 = vmatprep.subr.bf16.mxu0 %v3123_v15  ;;  %1039 = vmatprep.subr.bf16.mxu1 %v3126_v16  ;;  %v3156_v16 = vld [vmem:[#allocation7 + $0x1c] ss:$12 sps:$4 sm:$0xff]  }
 0x14a   :  { %v303_v29 = vmax.f32 %v267_v23, 0.0 }
 0x14b   :  { %v315_v30 = vpack.c.bf16 %v305_v26, %v304_v19  ;;  %v3154_v26 = vld [vmem:[#allocation7 + $0x18] ss:$12 sps:$4 sm:$0xff]  }
 0x14c   :  { %v314_v31 = vpack.c.bf16 %v303_v29, %v302_v22  ;;  %v2980_v32 = vpop.f32.mrb[12].mxu0  ;;  %927 = vmatpush1.bf16.msra.mxu0 %v3121_v24  ;;  %1040 = vmatpush1.bf16.msra.mxu1 %v3124_v25  ;;  %v3159_v29 = vld [vmem:[#allocation7 + $0x34] ss:$12 sps:$4 sm:$0xff]  }
 0x14d   :  { %v288_v36 = vadd.f32 %v2980_v32, %v3571_v37  ;;  %v279_v38 = vpop.f32.mrb[13].mxu0  ;;  %928 = vmatprep.subr.bf16.mxu0 %v3129_v27  ;;  %1041 = vmatprep.subr.bf16.mxu1 %v3132_v28  ;;  %v3184_v27 = vld [vmem:[#allocation7 + $0x20] ss:$12 sps:$4 sm:$0xff]  }
 0x14e   :  { %531 = vmatmul.mubr.bf16.gmra.mrb[8].mxu1 %v312_v9  ;;  %3006 = vmatprep.mubr.bf16.mxu0 %v314_v31  ;;  %v280_v41 = vadd.f32 %v279_v38, %v3571_v37  ;;  %v2981_v42 = vpop.f32.mrb[14].mxu0 }
 0x14f   :  { %540 = vmatprep.mubr.bf16.mxu1 %v3416_v34  ;;  %3007 = vmatmul.mubr.bf16.gmra.mrb[24].mxu0 %v315_v30  ;;  %v308_v43 = vmax.f32 %v288_v36, 0.0  ;;  %v291_v44 = vadd.f32 %v2981_v42, %v3571_v37  ;;  %v282_v45 = vpop.f32.mrb[15].mxu0  ;;  %v3189_v36 = vld [vmem:[#allocation7 + $0x38] ss:$12 sps:$4 sm:$0xff]  }
 0x150   :  { %v306_v46 = vmax.f32 %v280_v41, 0.0  ;;  %v283_v47 = vadd.f32 %v282_v45, %v3571_v37  ;;  %929 = vmatpush1.bf16.msra.mxu0 %v3127_v33  ;;  %1042 = vmatpush1.bf16.msra.mxu1 %v3130_v35  ;;  %v3141_v37 = vld [vmem:[#allocation5 + $0xc4] ss:$16 sps:$4 sm:$0xff]   ;;  %v3157_v35 = vld [vmem:[#allocation7 + $0x30] ss:$12 sps:$4 sm:$0xff]  }
 0x151   :  { %v309_v50 = vmax.f32 %v291_v44, 0.0  ;;  %930 = vmatprep.subr.bf16.mxu0 %v3135_v39  ;;  %1043 = vmatprep.subr.bf16.mxu1 %v3138_v40  ;;  %v3162_v39 = vld [vmem:[#allocation7 + $0x4c] ss:$12 sps:$4 sm:$0xff]   ;;  %v3193_v40 = vld [vmem:[#allocation7 + $0x110] ss:$12 sps:$4 sm:$0xff]  }
 0x152   :  { %v307_v51 = vmax.f32 %v283_v47, 0.0 }
 0x153   :  { %v317_v52 = vpack.c.bf16 %v309_v50, %v308_v43  ;;  %v3194_v50 = vld [vmem:[#allocation7 + $0x50] ss:$12 sps:$4 sm:$0xff]  }
 0x154   :  { %v316_v53 = vpack.c.bf16 %v307_v51, %v306_v46  ;;  %931 = vmatpush1.bf16.msra.mxu0 %v3133_v48  ;;  %1044 = vmatpush1.bf16.msra.mxu1 %v3136_v49  ;;  %v3160_v49 = vld [vmem:[#allocation7 + $0x48] ss:$12 sps:$4 sm:$0xff]  }
 0x155   :  { %932 = vmatprep.subr.bf16.mxu0 %v3141_v37  ;;  %1045 = vmatprep.subr.bf16.mxu1 %v3144_v54 }
 0x156   :  { %541 = vmatmul.mubr.bf16.gmra.mrb[12].mxu1 %v3582_v8  ;;  %3010 = vmatprep.mubr.bf16.mxu0 %v316_v53 }
 0x157   :  { %550 = vmatprep.mubr.bf16.mxu1 %v3416_v34  ;;  %3011 = vmatmul.mubr.bf16.gmra.mrb[28].mxu0 %v317_v52 }
 0x158   :  { %952 = vmatprep.mubr.bf16.mxu0 %v3416_v34  ;;  %933 = vmatpush1.bf16.msra.mxu0 %v3139_v55 }
 0x159   :  { %1046 = vmatpush1.bf16.msra.mxu1 %v3142_v56  ;;  %934 = vmatprep.subr.bf16.mxu0 %v3147_v57  ;;  %v3163_v56 = vld [vmem:[#allocation7 + $0x60] ss:$12 sps:$4 sm:$0xff]   ;;  %v3199_v57 = vld [vmem:[#allocation7 + $0x68] ss:$12 sps:$4 sm:$0xff]  }
 0x15a   :  { %1047 = vmatprep.subr.bf16.mxu1 %v3150_v58 }
 0x15c   :  { %935 = vmatpush1.bf16.msra.mxu0 %v3145_v59  ;;  %v3168_v59 = vld [vmem:[#allocation7 + $0x7c] ss:$12 sps:$4 sm:$0xff]  }
 0x15d   :  { %1048 = vmatpush1.bf16.msra.mxu1 %v3148_v60  ;;  %1589 = vmatprep.subr.bf16.mxu0 %v3153_v61  ;;  %v3203_v60 = vld [vmem:[#allocation7 + $0x140] ss:$12 sps:$4 sm:$0xff]  }
 0x15e   :  { %551 = vmatmul.mubr.bf16.gmra.mrb[16].mxu1 %v314_v31  ;;  %2820 = vmatprep.subr.bf16.mxu1 %v3178_v62 }
 0x15f   :  { %560 = vmatprep.mubr.bf16.mxu1 %v3416_v34 }
 0x166   :  { %561 = vmatmul.mubr.bf16.gmra.mrb[20].mxu1 %v315_v30  ;;  %v3188_v30 = vld [vmem:[#allocation7 + $0xf8] ss:$12 sps:$4 sm:$0xff]  }
 0x167   :  { %570 = vmatprep.mubr.bf16.mxu1 %v3416_v34 }
 0x16e   :  { %571 = vmatmul.mubr.bf16.gmra.mrb[24].mxu1 %v316_v53  ;;  %v3198_v53 = vld [vmem:[#allocation7 + $0x128] ss:$12 sps:$4 sm:$0xff]  }
 0x16f   :  { %580 = vmatprep.mubr.bf16.mxu1 %v3416_v34 }
 0x176   :  { %581 = vmatmul.mubr.bf16.gmra.mrb[28].mxu1 %v317_v52  ;;  %v3165_v52 = vld [vmem:[#allocation7 + $0x64] ss:$12 sps:$4 sm:$0xff]  }
 0x177   :  { %1065 = vmatprep.mubr.bf16.mxu1 %v3416_v34 }
 0x211   :  { %v512_v0 = vpop.f32.mrb[0].mxu1 }
 0x212   :  { %v688_v1 = vadd.f32 %v512_v0, %v3605_v63  ;;  %v3608_v2 = vpop.f32.mrb[1].mxu1  ;;  %v3610_v3 = vpop.f32.mrb[16].mxu0 }
 0x213   :  { %v516_v4 = vpop.f32.mrb[2].mxu1  ;;  %v3612_v5 = vpop.f32.mrb[17].mxu0 }
 0x214   :  { %v689_v6 = vadd.f32 %v516_v4, %v3605_v63  ;;  %v3615_v7 = vpop.f32.mrb[3].mxu1  ;;  %v3617_v8 = vpop.f32.mrb[18].mxu0  ;;  %v704_v10 = vmax.f32 %v688_v1, 0.0 }
 0x215   :  { %v3619_v9 = vpop.f32.mrb[19].mxu0 }
 0x216   :  { %v705_v11 = vmax.f32 %v689_v6, 0.0 }
 0x218   :  { %v720_v12 = vpack.c.bf16 %v705_v11, %v704_v10 }
 0x219   :  { %v522_v15 = vpop.f32.mrb[4].mxu1 }
 0x21a   :  { %v690_v18 = vadd.f32 %v522_v15, %v3605_v63  ;;  %v3622_v19 = vpop.f32.mrb[5].mxu1  ;;  %953 = vmatmul.mubr.bf16.vlgmr.msra.gmra.mrb[32].mxu0 %v720_v12  ;;  %1066 = vmatmul.mubr.bf16.vlgmr.msra.gmra.mrb[32].mxu1 %v720_v12  ;;  %v3624_v20 = vpop.f32.mrb[20].mxu0  ;;  %v3166_v12 = vld [vmem:[#allocation7 + $0x78] ss:$12 sps:$4 sm:$0xff]  }
 0x21b   :  { %v526_v21 = vpop.f32.mrb[6].mxu1  ;;  %v3626_v22 = vpop.f32.mrb[21].mxu0  ;;  %962 = vmatprep.mubr.bf16.mxu0 %v3416_v34  ;;  %1075 = vmatprep.mubr.bf16.mxu1 %v3416_v34 }
 0x21c   :  { %v691_v23 = vadd.f32 %v526_v21, %v3605_v63  ;;  %v3631_v24 = vpop.f32.mrb[7].mxu1  ;;  %v3633_v25 = vpop.f32.mrb[22].mxu0  ;;  %1590 = vmatpush1.bf16.msra.mxu0 %v3151_v13  ;;  %2821 = vmatpush3.bf16.msra.mxu1 %v3179_v14  ;;  %v706_v31 = vmax.f32 %v690_v18, 0.0  ;;  %v3171_v14 = vld [vmem:[#allocation7 + $0x94] ss:$12 sps:$4 sm:$0xff]  }
 0x21d   :  { %v3635_v28 = vpop.f32.mrb[23].mxu0  ;;  %1591 = vmatprep.subr.bf16.mxu0 %v3156_v16  ;;  %2822 = vmatprep.subr.bf16.mxu1 %v3183_v17  ;;  %v3169_v18 = vld [vmem:[#allocation7 + $0x90] ss:$12 sps:$4 sm:$0xff]  }
 0x21e   :  { %v707_v32 = vmax.f32 %v691_v23, 0.0  ;;  %v3174_v23 = vld [vmem:[#allocation7 + $0xac] ss:$12 sps:$4 sm:$0xff]  }
 0x220   :  { %v721_v33 = vpack.c.bf16 %v707_v32, %v706_v31  ;;  %1592 = vmatpush1.bf16.msra.mxu0 %v3154_v26  ;;  %2823 = vmatpush3.bf16.msra.mxu1 %v3184_v27  ;;  %v3172_v32 = vld [vmem:[#allocation7 + $0xa8] ss:$12 sps:$4 sm:$0xff]  }
 0x221   :  { %v532_v38 = vpop.f32.mrb[8].mxu1  ;;  %1593 = vmatprep.subr.bf16.mxu0 %v3159_v29  ;;  %2824 = vmatprep.subr.bf16.mxu1 %v3188_v30 }
 0x222   :  { %v692_v41 = vadd.f32 %v532_v38, %v3605_v63  ;;  %v3638_v42 = vpop.f32.mrb[9].mxu1  ;;  %963 = vmatmul.mubr.bf16.gmra.mrb[36].mxu0 %v721_v33  ;;  %1076 = vmatmul.mubr.bf16.gmra.mrb[36].mxu1 %v721_v33  ;;  %v3640_v43 = vpop.f32.mrb[24].mxu0  ;;  %v3177_v33 = vld [vmem:[#allocation7 + $0xc4] ss:$12 sps:$4 sm:$0xff]  }
 0x223   :  { %v536_v44 = vpop.f32.mrb[10].mxu1  ;;  %972 = vmatprep.mubr.bf16.mxu0 %v3416_v34  ;;  %1085 = vmatprep.mubr.bf16.mxu1 %v3416_v34  ;;  %v3644_v45 = vpop.f32.mrb[25].mxu0 }
 0x224   :  { %v693_v46 = vadd.f32 %v536_v44, %v3605_v63  ;;  %v3647_v47 = vpop.f32.mrb[11].mxu1  ;;  %v3649_v48 = vpop.f32.mrb[26].mxu0  ;;  %1594 = vmatpush1.bf16.msra.mxu0 %v3157_v35  ;;  %2825 = vmatpush3.bf16.msra.mxu1 %v3189_v36  ;;  %v708_v37 = vmax.f32 %v692_v41, 0.0  ;;  %v3182_v41 = vld [vmem:[#allocation7 + $0xdc] ss:$12 sps:$4 sm:$0xff]  }
 0x225   :  { %v3651_v51 = vpop.f32.mrb[27].mxu0  ;;  %1595 = vmatprep.subr.bf16.mxu0 %v3162_v39  ;;  %2826 = vmatprep.subr.bf16.mxu1 %v3193_v40  ;;  %v3175_v39 = vld [vmem:[#allocation7 + $0xc0] ss:$12 sps:$4 sm:$0xff]  }
 0x226   :  { %v709_v54 = vmax.f32 %v693_v46, 0.0 }
 0x228   :  { %v722_v55 = vpack.c.bf16 %v709_v54, %v708_v37  ;;  %1596 = vmatpush1.bf16.msra.mxu0 %v3160_v49  ;;  %2827 = vmatpush3.bf16.msra.mxu1 %v3194_v50  ;;  %v3187_v37 = vld [vmem:[#allocation7 + $0xf4] ss:$12 sps:$4 sm:$0xff]  }
 0x229   :  { %v542_v58 = vpop.f32.mrb[12].mxu1  ;;  %1597 = vmatprep.subr.bf16.mxu0 %v3165_v52  ;;  %2828 = vmatprep.subr.bf16.mxu1 %v3198_v53  ;;  %v3180_v53 = vld [vmem:[#allocation7 + $0xd8] ss:$12 sps:$4 sm:$0xff]  }
 0x22a   :  { %v694_v61 = vadd.f32 %v542_v58, %v3605_v63  ;;  %v3654_v62 = vpop.f32.mrb[13].mxu1  ;;  %973 = vmatmul.mubr.bf16.gmra.mrb[40].mxu0 %v722_v55  ;;  %1086 = vmatmul.mubr.bf16.gmra.mrb[40].mxu1 %v722_v55  ;;  %v3656_v0 = vpop.f32.mrb[28].mxu0 }
 0x22b   :  { %v546_v1 = vpop.f32.mrb[14].mxu1  ;;  %982 = vmatprep.mubr.bf16.mxu0 %v3416_v34  ;;  %1095 = vmatprep.mubr.bf16.mxu1 %v3416_v34  ;;  %v3660_v4 = vpop.f32.mrb[29].mxu0 }
 0x22c   :  { %v695_v6 = vadd.f32 %v546_v1, %v3605_v63  ;;  %v3663_v10 = vpop.f32.mrb[15].mxu1  ;;  %v3665_v11 = vpop.f32.mrb[30].mxu0  ;;  %1598 = vmatpush1.bf16.msra.mxu0 %v3163_v56  ;;  %2829 = vmatpush3.bf16.msra.mxu1 %v3199_v57  ;;  %v710_v15 = vmax.f32 %v694_v61, 0.0  ;;  %v3185_v57 = vld [vmem:[#allocation7 + $0xf0] ss:$12 sps:$4 sm:$0xff]  }
 0x22d   :  { %v3667_v13 = vpop.f32.mrb[31].mxu0  ;;  %1599 = vmatprep.subr.bf16.mxu0 %v3168_v59  ;;  %2830 = vmatprep.subr.bf16.mxu1 %v3203_v60  ;;  %v3192_v59 = vld [vmem:[#allocation7 + $0x10c] ss:$12 sps:$4 sm:$0xff]  }
 0x22e   :  { %v711_v16 = vmax.f32 %v695_v6, 0.0 }
 0x230   :  { %v723_v17 = vpack.c.bf16 %v711_v16, %v710_v15  ;;  %1600 = vmatpush1.bf16.msra.mxu0 %v3166_v12  ;;  %v3197_v15 = vld [vmem:[#allocation7 + $0x124] ss:$12 sps:$4 sm:$0xff]  }
 0x231   :  { %v552_v21 = vpop.f32.mrb[16].mxu1  ;;  %1601 = vmatprep.subr.bf16.mxu0 %v3171_v14  ;;  %v3190_v14 = vld [vmem:[#allocation7 + $0x108] ss:$12 sps:$4 sm:$0xff]  }
 0x232   :  { %v696_v26 = vadd.f32 %v552_v21, %v3605_v63  ;;  %v3670_v27 = vpop.f32.mrb[17].mxu1  ;;  %983 = vmatmul.mubr.bf16.gmra.mrb[44].mxu0 %v723_v17  ;;  %1096 = vmatmul.mubr.bf16.gmra.mrb[44].mxu1 %v723_v17  ;;  %v3195_v21 = vld [vmem:[#allocation7 + $0x120] ss:$12 sps:$4 sm:$0xff]  }
 0x233   :  { %v556_v29 = vpop.f32.mrb[18].mxu1  ;;  %992 = vmatprep.mubr.bf16.mxu0 %v3416_v34  ;;  %1105 = vmatprep.mubr.bf16.mxu1 %v3416_v34 }
 0x234   :  { %v697_v30 = vadd.f32 %v556_v29, %v3605_v63  ;;  %v3675_v31 = vpop.f32.mrb[19].mxu1  ;;  %1602 = vmatpush1.bf16.msra.mxu0 %v3169_v18  ;;  %v712_v35 = vmax.f32 %v696_v26, 0.0  ;;  %v3202_v26 = vld [vmem:[#allocation7 + $0x13c] ss:$12 sps:$4 sm:$0xff]  }
 0x235   :  { %1603 = vmatprep.subr.bf16.mxu0 %v3174_v23 }
 0x236   :  { %v713_v36 = vmax.f32 %v697_v30, 0.0 }
 0x238   :  { %v724_v38 = vpack.c.bf16 %v713_v36, %v712_v35  ;;  %1604 = vmatpush1.bf16.msra.mxu0 %v3172_v32  ;;  %v3200_v36 = vld [vmem:[#allocation7 + $0x138] ss:$12 sps:$4 sm:$0xff]  }
 0x239   :  { %v562_v40 = vpop.f32.mrb[20].mxu1  ;;  %1605 = vmatprep.subr.bf16.mxu0 %v3177_v33 }
 0x23a   :  { %v698_v44 = vadd.f32 %v562_v40, %v3605_v63  ;;  %v3678_v46 = vpop.f32.mrb[21].mxu1  ;;  %993 = vmatmul.mubr.bf16.gmra.mrb[48].mxu0 %v724_v38  ;;  %1106 = vmatmul.mubr.bf16.gmra.mrb[48].mxu1 %v724_v38 }
 0x23b   :  { %v566_v49 = vpop.f32.mrb[22].mxu1  ;;  %1002 = vmatprep.mubr.bf16.mxu0 %v3416_v34  ;;  %1115 = vmatprep.mubr.bf16.mxu1 %v3416_v34 }
 0x23c   :  { %v699_v50 = vadd.f32 %v566_v49, %v3605_v63  ;;  %v3683_v52 = vpop.f32.mrb[23].mxu1  ;;  %1606 = vmatpush1.bf16.msra.mxu0 %v3175_v39  ;;  %v714_v54 = vmax.f32 %v698_v44, 0.0  ;;  %v3207_v44 = vld [vmem:[#allocation7 + $0x154] ss:$12 sps:$4 sm:$0xff]   ;;  %v3208_v49 = vld [vmem:[#allocation7 + $0x158] ss:$12 sps:$4 sm:$0xff]  }
 0x23d   :  { %1607 = vmatprep.subr.bf16.mxu0 %v3182_v41  ;;  %v3204_v41 = vld [vmem:[#allocation7 + $0x80] ss:$12 sps:$4 sm:$0xff]  }
 0x23e   :  { %v715_v55 = vmax.f32 %v699_v50, 0.0  ;;  %2831 = vmatpush3.bf16.msra.mxu1 %v3204_v41  ;;  %v3205_v50 = vld [vmem:[#allocation7 + $0x150] ss:$12 sps:$4 sm:$0xff]  }
 0x23f   :  { %2832 = vmatprep.subr.bf16.mxu1 %v3208_v49 }
 0x240   :  { %v725_v56 = vpack.c.bf16 %v715_v55, %v714_v54  ;;  %1608 = vmatpush1.bf16.msra.mxu0 %v3180_v53  ;;  %v3209_v53 = vld [vmem:[#allocation7 + $0x98] ss:$12 sps:$4 sm:$0xff]   ;;  %v3210_v54 = vld [vmem:[#allocation7 + $0x168] ss:$12 sps:$4 sm:$0xff]   ;;  %v3214_v55 = vld [vmem:[#allocation7 + $0xb0] ss:$12 sps:$4 sm:$0xff]  }
 0x241   :  { %v572_v58 = vpop.f32.mrb[24].mxu1  ;;  %1609 = vmatprep.subr.bf16.mxu0 %v3187_v37  ;;  %v3213_v37 = vld [vmem:[#allocation7 + $0x170] ss:$12 sps:$4 sm:$0xff]  }
 0x242   :  { %v700_v60 = vadd.f32 %v572_v58, %v3605_v63  ;;  %v3686_v61 = vpop.f32.mrb[25].mxu1  ;;  %1003 = vmatmul.mubr.bf16.gmra.mrb[52].mxu0 %v725_v56  ;;  %1116 = vmatmul.mubr.bf16.gmra.mrb[52].mxu1 %v725_v56  ;;  %v1147_v56 = vlaneseq }
 0x243   :  { %v576_v1 = vpop.f32.mrb[26].mxu1  ;;  %1012 = vmatprep.mubr.bf16.mxu0 %v3416_v34  ;;  %1125 = vmatprep.mubr.bf16.mxu1 %v3416_v34 }
 0x244   :  { %v701_v6 = vadd.f32 %v576_v1, %v3605_v63  ;;  %v3691_v12 = vpop.f32.mrb[27].mxu1  ;;  %1610 = vmatpush1.bf16.msra.mxu0 %v3185_v57  ;;  %v716_v16 = vmax.f32 %v700_v60, 0.0  ;;  %2833 = vmatpush3.bf16.msra.mxu1 %v3209_v53  ;;  %v3701_v57 = vshrl.u32 %v1147_v56, 7 }
 0x245   :  { %1611 = vmatprep.subr.bf16.mxu0 %v3192_v59  ;;  %2834 = vmatprep.subr.bf16.mxu1 %v3213_v37  ;;  %v2633_v59 = vld [vmem:[%s4139_s8 + $0x2] ss:$8 sm:$0x3] }
 0x246   :  { %v717_v17 = vmax.f32 %v701_v6, 0.0  ;;  %v3704_v58 = vsub.s32 0, %v3701_v57  ;;  %v3710_v60 = vsub.s32 1, %v3701_v57 }
 0x248   :  { %v726_v18 = vpack.c.bf16 %v717_v17, %v716_v16  ;;  %1612 = vmatpush1.bf16.msra.mxu0 %v3190_v14  ;;  %2835 = vmatpush3.bf16.msra.mxu1 %v3214_v55  ;;  %v3713_v1 = vrot.slane %v2633_v59, %v3704_v58  ;;  %v3716_v6 = vrot.slane %v2633_v59, %v3710_v60 }
 0x249   :  { %v582_v23 = vpop.f32.mrb[28].mxu1  ;;  %1613 = vmatprep.subr.bf16.mxu0 %v3197_v15 }
 0x24a   :  { %v702_v29 = vadd.f32 %v582_v23, %v3605_v63  ;;  %v3694_v30 = vpop.f32.mrb[29].mxu1  ;;  %1013 = vmatmul.mubr.bf16.gmra.mrb[56].mxu0 %v726_v18  ;;  %1126 = vmatmul.mubr.bf16.gmra.mrb[56].mxu1 %v726_v18 }
 0x24b   :  { %v586_v32 = vpop.f32.mrb[30].mxu1  ;;  %1022 = vmatprep.mubr.bf16.mxu0 %v3416_v34  ;;  %1135 = vmatprep.mubr.bf16.mxu1 %v3416_v34 }
 0x24c   :  { %v703_v33 = vadd.f32 %v586_v32, %v3605_v63  ;;  %v3699_v35 = vpop.f32.mrb[31].mxu1  ;;  %1614 = vmatpush1.bf16.msra.mxu0 %v3195_v21  ;;  %v718_v38 = vmax.f32 %v702_v29, 0.0  ;;  %v3212_v63 = vld [vmem:[#allocation7 + $0x16c] ss:$12 sps:$4 sm:$0xff]  }
 0x24d   :  { %1615 = vmatprep.subr.bf16.mxu0 %v3202_v26 }
 0x24e   :  { %v719_v39 = vmax.f32 %v703_v33, 0.0 }
 0x250   :  { %v727_v40 = vpack.c.bf16 %v719_v39, %v718_v38  ;;  %1616 = vmatpush1.bf16.msra.mxu0 %v3200_v36 }
 0x251   :  { %1617 = vmatprep.subr.bf16.mxu0 %v3207_v44 }
 0x252   :  { %1023 = vmatmul.mubr.bf16.gmra.mrb[60].mxu0 %v727_v40  ;;  %1136 = vmatmul.mubr.bf16.gmra.mrb[60].mxu1 %v727_v40 }
 0x254   :  { %1618 = vmatpush1.bf16.msra.mxu0 %v3205_v50 }
 0x255   :  { %1619 = vmatprep.subr.bf16.mxu0 %v3212_v63 }
 0x258   :  { %1620 = vmatpush1.bf16.msra.mxu0 %v3210_v54 }
 0x2ed   :  { %v954_v14 = vpop.f32.mrb[32].mxu0  ;;  %v1067_v15 = vpop.f32.mrb[32].mxu1 }
 0x2ee   :  { %v1157_v16 = vadd.f32 %v3713_v1, %v954_v14  ;;  %v3720_v17 = vadd.f32 %v1067_v15, %v3608_v2  ;;  %v956_v18 = vpop.f32.mrb[33].mxu0  ;;  %v1069_v21 = vpop.f32.mrb[33].mxu1 }
 0x2ef   :  { %v1158_v23 = vadd.f32 %v3716_v6, %v956_v18  ;;  %v3724_v26 = vadd.f32 %v1069_v21, %v3612_v5  ;;  %v958_v29 = vpop.f32.mrb[34].mxu0  ;;  %v1071_v32 = vpop.f32.mrb[34].mxu1 }
 0x2f0   :  { %v1159_v33 = vadd.f32 %v3713_v1, %v958_v29  ;;  %v3728_v36 = vadd.f32 %v1071_v32, %v3615_v7  ;;  %v960_v38 = vpop.f32.mrb[35].mxu0  ;;  %v1073_v39 = vpop.f32.mrb[35].mxu1  ;;  %v1189_v41 = vmax.f32 %v1157_v16, 0.0 }
 0x2f1   :  { %v1160_v40 = vadd.f32 %v3716_v6, %v960_v38  ;;  %v3732_v2 = vadd.f32 %v1073_v39, %v3619_v9  ;;  %v1190_v49 = vmax.f32 %v1158_v23, 0.0 }
 0x2f2   :  { %v1191_v44 = vmax.f32 %v1159_v33, 0.0 }
 0x2f3   :  { %v1192_v50 = vmax.f32 %v1160_v40, 0.0 }
 0x2f4   :  { %v1253_v5 = vpack.c.bf16 %v1191_v44, %v1189_v41 }
 0x2f5   :  { %v1254_v53 = vpack.c.bf16 %v1192_v50, %v1190_v49  ;;  %v964_v63 = vpop.f32.mrb[36].mxu0  ;;  %v1077_v37 = vpop.f32.mrb[36].mxu1 }
 0x2f6   :  { %v1161_v54 = vadd.f32 %v3713_v1, %v964_v63  ;;  %v3736_v7 = vadd.f32 %v1077_v37, %v3622_v19  ;;  %v966_v55 = vpop.f32.mrb[37].mxu0  ;;  %v1079_v56 = vpop.f32.mrb[37].mxu1 }
 0x2f7   :  { %v1162_v59 = vadd.f32 %v3716_v6, %v966_v55  ;;  %v3740_v9 = vadd.f32 %v3610_v3, %v1079_v56  ;;  %v968_v14 = vpop.f32.mrb[38].mxu0  ;;  %v1081_v15 = vpop.f32.mrb[38].mxu1  ;;  %1621 = vmatprep.mubr.bf16.mxu0 %v1254_v53  ;;  %1734 = vmatprep.mubr.bf16.mxu1 %v1254_v53 }
 0x2f8   :  { %v1163_v16 = vadd.f32 %v3713_v1, %v968_v14  ;;  %v3744_v18 = vadd.f32 %v1081_v15, %v3631_v24  ;;  %v970_v21 = vpop.f32.mrb[39].mxu0  ;;  %v1083_v23 = vpop.f32.mrb[39].mxu1  ;;  %1622 = vmatmul.mubr.bf16.vlgmr.msra.gmra.mrb[64].mxu0 %v1253_v5  ;;  %1735 = vmatmul.mubr.bf16.vlgmr.msra.gmra.mrb[64].mxu1 %v1253_v5  ;;  %v1193_v3 = vmax.f32 %v1161_v54, 0.0 }
 0x2f9   :  { %v1164_v19 = vadd.f32 %v3716_v6, %v970_v21  ;;  %v3748_v29 = vadd.f32 %v3617_v8, %v1083_v23  ;;  %v1194_v33 = vmax.f32 %v1162_v59, 0.0 }
 0x2fa   :  { %v1195_v32 = vmax.f32 %v1163_v16, 0.0 }
 0x2fb   :  { %v1196_v38 = vmax.f32 %v1164_v19, 0.0 }
 0x2fc   :  { %v1255_v39 = vpack.c.bf16 %v1195_v32, %v1193_v3 }
 0x2fd   :  { %v1256_v40 = vpack.c.bf16 %v1196_v38, %v1194_v33  ;;  %v974_v41 = vpop.f32.mrb[40].mxu0  ;;  %v1087_v44 = vpop.f32.mrb[40].mxu1 }
 0x2fe   :  { %v1165_v24 = vadd.f32 %v3713_v1, %v974_v41  ;;  %v3752_v49 = vadd.f32 %v1087_v44, %v3638_v42  ;;  %v976_v50 = vpop.f32.mrb[41].mxu0  ;;  %v1089_v5 = vpop.f32.mrb[41].mxu1 }
 0x2ff   :  { %v1166_v53 = vadd.f32 %v3716_v6, %v976_v50  ;;  %v3756_v8 = vadd.f32 %v1089_v5, %v3626_v22  ;;  %v978_v63 = vpop.f32.mrb[42].mxu0  ;;  %v1091_v37 = vpop.f32.mrb[42].mxu1  ;;  %1631 = vmatprep.mubr.bf16.mxu0 %v1256_v40  ;;  %1742 = vmatprep.mubr.bf16.mxu1 %v1256_v40 }
 0x300   :  { %v1167_v54 = vadd.f32 %v3713_v1, %v978_v63  ;;  %v3760_v55 = vadd.f32 %v1091_v37, %v3647_v47  ;;  %v980_v56 = vpop.f32.mrb[43].mxu0  ;;  %v1093_v59 = vpop.f32.mrb[43].mxu1  ;;  %1632 = vmatmul.mubr.bf16.gmra.mrb[68].mxu0 %v1255_v39  ;;  %1743 = vmatmul.mubr.bf16.gmra.mrb[68].mxu1 %v1255_v39  ;;  %v1197_v22 = vmax.f32 %v1165_v24, 0.0 }
 0x301   :  { %v1168_v42 = vadd.f32 %v3716_v6, %v980_v56  ;;  %v3764_v14 = vadd.f32 %v1093_v59, %v3635_v28  ;;  %v1198_v16 = vmax.f32 %v1166_v53, 0.0 }
 0x302   :  { %v1199_v15 = vmax.f32 %v1167_v54, 0.0 }
 0x303   :  { %v1200_v21 = vmax.f32 %v1168_v42, 0.0 }
 0x304   :  { %v1257_v23 = vpack.c.bf16 %v1199_v15, %v1197_v22 }
 0x305   :  { %v1258_v19 = vpack.c.bf16 %v1200_v21, %v1198_v16  ;;  %v984_v3 = vpop.f32.mrb[44].mxu0  ;;  %v1097_v32 = vpop.f32.mrb[44].mxu1 }
 0x306   :  { %v1169_v47 = vadd.f32 %v3713_v1, %v984_v3  ;;  %v3768_v33 = vadd.f32 %v1097_v32, %v3654_v62  ;;  %v986_v38 = vpop.f32.mrb[45].mxu0  ;;  %v1099_v39 = vpop.f32.mrb[45].mxu1 }
 0x307   :  { %v1170_v40 = vadd.f32 %v3716_v6, %v986_v38  ;;  %v3772_v28 = vadd.f32 %v3624_v20, %v1099_v39  ;;  %v988_v41 = vpop.f32.mrb[46].mxu0  ;;  %v1101_v44 = vpop.f32.mrb[46].mxu1  ;;  %1641 = vmatprep.mubr.bf16.mxu0 %v1258_v19  ;;  %1750 = vmatprep.mubr.bf16.mxu1 %v1258_v19 }
 0x308   :  { %v1171_v24 = vadd.f32 %v3713_v1, %v988_v41  ;;  %v3776_v50 = vadd.f32 %v1101_v44, %v3663_v10  ;;  %v990_v5 = vpop.f32.mrb[47].mxu0  ;;  %v1103_v53 = vpop.f32.mrb[47].mxu1  ;;  %1642 = vmatmul.mubr.bf16.gmra.mrb[72].mxu0 %v1257_v23  ;;  %1751 = vmatmul.mubr.bf16.gmra.mrb[72].mxu1 %v1257_v23  ;;  %v1201_v20 = vmax.f32 %v1169_v47, 0.0 }
 0x309   :  { %v1172_v62 = vadd.f32 %v3716_v6, %v990_v5  ;;  %v3780_v63 = vadd.f32 %v3633_v25, %v1103_v53  ;;  %v1202_v54 = vmax.f32 %v1170_v40, 0.0 }
 0x30a   :  { %v1203_v37 = vmax.f32 %v1171_v24, 0.0 }
 0x30b   :  { %v1204_v56 = vmax.f32 %v1172_v62, 0.0 }
 0x30c   :  { %v1259_v59 = vpack.c.bf16 %v1203_v37, %v1201_v20 }
 0x30d   :  { %v1260_v42 = vpack.c.bf16 %v1204_v56, %v1202_v54  ;;  %v994_v22 = vpop.f32.mrb[48].mxu0  ;;  %v1107_v15 = vpop.f32.mrb[48].mxu1 }
 0x30e   :  { %v1173_v10 = vadd.f32 %v3713_v1, %v994_v22  ;;  %v3784_v16 = vadd.f32 %v1107_v15, %v3670_v27  ;;  %v996_v21 = vpop.f32.mrb[49].mxu0  ;;  %v1109_v23 = vpop.f32.mrb[49].mxu1 }
 0x30f   :  { %v1174_v19 = vadd.f32 %v3716_v6, %v996_v21  ;;  %v3788_v25 = vadd.f32 %v1109_v23, %v3644_v45  ;;  %v998_v3 = vpop.f32.mrb[50].mxu0  ;;  %v1111_v32 = vpop.f32.mrb[50].mxu1  ;;  %1651 = vmatprep.mubr.bf16.mxu0 %v1260_v42  ;;  %1758 = vmatprep.mubr.bf16.mxu1 %v1260_v42 }
 0x310   :  { %v1175_v47 = vadd.f32 %v3713_v1, %v998_v3  ;;  %v3792_v38 = vadd.f32 %v1111_v32, %v3675_v31  ;;  %v1000_v39 = vpop.f32.mrb[51].mxu0  ;;  %v1113_v40 = vpop.f32.mrb[51].mxu1  ;;  %1652 = vmatmul.mubr.bf16.gmra.mrb[76].mxu0 %v1259_v59  ;;  %1759 = vmatmul.mubr.bf16.gmra.mrb[76].mxu1 %v1259_v59  ;;  %v1205_v45 = vmax.f32 %v1173_v10, 0.0 }
 0x311   :  { %v1176_v27 = vadd.f32 %v3716_v6, %v1000_v39  ;;  %v3796_v41 = vadd.f32 %v1113_v40, %v3651_v51  ;;  %v1206_v24 = vmax.f32 %v1174_v19, 0.0 }
 0x312   :  { %v1207_v44 = vmax.f32 %v1175_v47, 0.0 }
 0x313   :  { %v1208_v5 = vmax.f32 %v1176_v27, 0.0 }
 0x314   :  { %v1261_v53 = vpack.c.bf16 %v1207_v44, %v1205_v45 }
 0x315   :  { %v1262_v62 = vpack.c.bf16 %v1208_v5, %v1206_v24  ;;  %v1004_v20 = vpop.f32.mrb[52].mxu0  ;;  %v1117_v37 = vpop.f32.mrb[52].mxu1 }
 0x316   :  { %v1177_v31 = vadd.f32 %v3713_v1, %v1004_v20  ;;  %v3800_v54 = vadd.f32 %v1117_v37, %v3678_v46  ;;  %v1006_v56 = vpop.f32.mrb[53].mxu0  ;;  %v1119_v59 = vpop.f32.mrb[53].mxu1 }
 0x317   :  { %v1178_v42 = vadd.f32 %v3716_v6, %v1006_v56  ;;  %v3804_v51 = vadd.f32 %v3640_v43, %v1119_v59  ;;  %v1008_v22 = vpop.f32.mrb[54].mxu0  ;;  %v1121_v15 = vpop.f32.mrb[54].mxu1  ;;  %1661 = vmatprep.mubr.bf16.mxu0 %v1262_v62  ;;  %1766 = vmatprep.mubr.bf16.mxu1 %v1262_v62 }
 0x318   :  { %v1179_v10 = vadd.f32 %v3713_v1, %v1008_v22  ;;  %v3808_v21 = vadd.f32 %v1121_v15, %v3683_v52  ;;  %v1010_v23 = vpop.f32.mrb[55].mxu0  ;;  %v1123_v19 = vpop.f32.mrb[55].mxu1  ;;  %1662 = vmatmul.mubr.bf16.gmra.mrb[80].mxu0 %v1261_v53  ;;  %1767 = vmatmul.mubr.bf16.gmra.mrb[80].mxu1 %v1261_v53  ;;  %v1209_v43 = vmax.f32 %v1177_v31, 0.0 }
 0x319   :  { %v1180_v46 = vadd.f32 %v3716_v6, %v1010_v23  ;;  %v3812_v3 = vadd.f32 %v3649_v48, %v1123_v19  ;;  %v1210_v47 = vmax.f32 %v1178_v42, 0.0 }
 0x31a   :  { %v1211_v32 = vmax.f32 %v1179_v10, 0.0 }
 0x31b   :  { %v1212_v39 = vmax.f32 %v1180_v46, 0.0 }
 0x31c   :  { %v1263_v40 = vpack.c.bf16 %v1211_v32, %v1209_v43 }
 0x31d   :  { %v1264_v27 = vpack.c.bf16 %v1212_v39, %v1210_v47  ;;  %v1014_v45 = vpop.f32.mrb[56].mxu0  ;;  %v1127_v44 = vpop.f32.mrb[56].mxu1 }
 0x31e   :  { %v1181_v52 = vadd.f32 %v3713_v1, %v1014_v45  ;;  %v3816_v24 = vadd.f32 %v1127_v44, %v3686_v61  ;;  %v1016_v5 = vpop.f32.mrb[57].mxu0  ;;  %v1129_v53 = vpop.f32.mrb[57].mxu1 }
 0x31f   :  { %v1182_v62 = vadd.f32 %v3716_v6, %v1016_v5  ;;  %v3820_v48 = vadd.f32 %v1129_v53, %v3660_v4  ;;  %v1018_v20 = vpop.f32.mrb[58].mxu0  ;;  %v1131_v37 = vpop.f32.mrb[58].mxu1  ;;  %1671 = vmatprep.mubr.bf16.mxu0 %v1264_v27  ;;  %1774 = vmatprep.mubr.bf16.mxu1 %v1264_v27 }
 0x320   :  { %v1183_v31 = vadd.f32 %v3713_v1, %v1018_v20  ;;  %v3824_v56 = vadd.f32 %v1131_v37, %v3691_v12  ;;  %v1020_v59 = vpop.f32.mrb[59].mxu0  ;;  %v1133_v42 = vpop.f32.mrb[59].mxu1  ;;  %1672 = vmatmul.mubr.bf16.gmra.mrb[84].mxu0 %v1263_v40  ;;  %1775 = vmatmul.mubr.bf16.gmra.mrb[84].mxu1 %v1263_v40  ;;  %v1213_v4 = vmax.f32 %v1181_v52, 0.0 }
 0x321   :  { %v1184_v61 = vadd.f32 %v3716_v6, %v1020_v59  ;;  %v3828_v22 = vadd.f32 %v1133_v42, %v3667_v13  ;;  %v1214_v10 = vmax.f32 %v1182_v62, 0.0 }
 0x322   :  { %v1215_v15 = vmax.f32 %v1183_v31, 0.0 }
 0x323   :  { %v1216_v23 = vmax.f32 %v1184_v61, 0.0 }
 0x324   :  { %v1265_v19 = vpack.c.bf16 %v1215_v15, %v1213_v4  ;;  %v3220_v4 = vld [vmem:[#allocation8 + $0x14] ss:$8 sps:$4 sm:$0xff]   ;;  %v3221_v15 = vld [vmem:[#allocation8 + $0x20] ss:$8 sps:$4 sm:$0xff]  }
 0x325   :  { %v1266_v46 = vpack.c.bf16 %v1216_v23, %v1214_v10  ;;  %v1024_v43 = vpop.f32.mrb[60].mxu0  ;;  %v1137_v32 = vpop.f32.mrb[60].mxu1  ;;  %v3226_v10 = vld [vmem:[#allocation8 + $0x34] ss:$8 sps:$4 sm:$0xff]   ;;  %v3224_v23 = vld [vmem:[#allocation8 + $0x30] ss:$8 sps:$4 sm:$0xff]  }
 0x326   :  { %v1185_v12 = vadd.f32 %v3713_v1, %v1024_v43  ;;  %v3832_v47 = vadd.f32 %v1137_v32, %v3694_v30  ;;  %v1026_v39 = vpop.f32.mrb[61].mxu0  ;;  %v1139_v40 = vpop.f32.mrb[61].mxu1  ;;  %v3230_v43 = vld [vmem:[#allocation8 + $0x50] ss:$8 sps:$4 sm:$0xff]   ;;  %v3235_v32 = vld [vmem:[#allocation8 + $0x64] ss:$8 sps:$4 sm:$0xff]  }
 0x327   :  { %v1186_v27 = vadd.f32 %v3716_v6, %v1026_v39  ;;  %v3836_v13 = vadd.f32 %v3656_v0, %v1139_v40  ;;  %v1028_v45 = vpop.f32.mrb[62].mxu0  ;;  %v1141_v44 = vpop.f32.mrb[62].mxu1  ;;  %1681 = vmatprep.mubr.bf16.mxu0 %v1266_v46  ;;  %1782 = vmatprep.mubr.bf16.mxu1 %v1266_v46  ;;  %v3227_v46 = vld [vmem:[#allocation8 + $0x40] ss:$8 sps:$4 sm:$0xff]   ;;  %v3238_v39 = vld [vmem:[#allocation8 + $0x74] ss:$8 sps:$4 sm:$0xff]  }
 0x328   :  { %v1187_v52 = vadd.f32 %v3713_v1, %v1028_v45  ;;  %v3840_v5 = vadd.f32 %v1141_v44, %v3699_v35  ;;  %v1030_v53 = vpop.f32.mrb[63].mxu0  ;;  %v1143_v62 = vpop.f32.mrb[63].mxu1  ;;  %1682 = vmatmul.mubr.bf16.gmra.mrb[88].mxu0 %v1265_v19  ;;  %1783 = vmatmul.mubr.bf16.gmra.mrb[88].mxu1 %v1265_v19  ;;  %v1217_v0 = vmax.f32 %v1185_v12, 0.0  ;;  %v3215_v35 = vld [vmem:[#allocation8] ss:$8 sps:$4 sm:$0xff]  }
 0x329   :  { %v1188_v30 = vadd.f32 %v3716_v6, %v1030_v53  ;;  %v3844_v20 = vadd.f32 %v3665_v11, %v1143_v62  ;;  %v1218_v31 = vmax.f32 %v1186_v27, 0.0  ;;  %v3217_v1 = vld [vmem:[#allocation8 + $0x4] ss:$8 sps:$4 sm:$0xff]   ;;  %v3218_v6 = vld [vmem:[#allocation8 + $0x10] ss:$8 sps:$4 sm:$0xff]  }
 0x32a   :  { %v1219_v37 = vmax.f32 %v1187_v52, 0.0  ;;  %2022 = vmatprep.subr.bf16.mxu0 %v3217_v1  ;;  %v3223_v11 = vld [vmem:[#allocation8 + $0x24] ss:$8 sps:$4 sm:$0xff]   ;;  %v3233_v12 = vld [vmem:[#allocation8 + $0x60] ss:$8 sps:$4 sm:$0xff]   ;;  %v3243_v53 = vld [vmem:[#allocation10 + $0x50] sm:$0xff]  }
 0x32b   :  { %v1220_v59 = vmax.f32 %v1188_v30, 0.0  ;;  %2023 = vmatpush1.bf16.msra.mxu0 %v3215_v35  ;;  %v3229_v19 = vld [vmem:[#allocation8 + $0x44] ss:$8 sps:$4 sm:$0xff]   ;;  %v3236_v40 = vld [vmem:[#allocation8 + $0x70] ss:$8 sps:$4 sm:$0xff]  }
 0x32c   :  { %v1267_v42 = vpack.c.bf16 %v1219_v37, %v1217_v0  ;;  %2024 = vmatprep.subr.bf16.mxu0 %v3220_v4  ;;  %v3239_v27 = vld [vmem:[#allocation10 + $0x40] sm:$0xff]   ;;  %v3241_v44 = vld [vmem:[#allocation10 + $0x48] sm:$0xff]   ;;  %v3244_v62 = vld [vmem:[#allocation10 + $0x10] sm:$0xff]  }
 0x32d   :  { %v1268_v61 = vpack.c.bf16 %v1220_v59, %v1218_v31  ;;  %v3240_v45 = vld [vmem:[#allocation10] sm:$0xff]   ;;  %2884 = vmatprep.subr.bf16.mxu1 %v3239_v27  ;;  %v3242_v52 = vld [vmem:[#allocation10 + $0x8] sm:$0xff]   ;;  %v3245_v30 = vld [vmem:[#allocation10 + $0x58] sm:$0xff]  }
 0x32e   :  { %2885 = vmatpush3.bf16.msra.mxu1 %v3240_v45  ;;  %v3246_v0 = vld [vmem:[#allocation10 + $0x18] sm:$0xff]   ;;  %v3247_v37 = vld [vmem:[#allocation10 + $0x60] sm:$0xff]   ;;  %v3249_v59 = vld [vmem:[#allocation10 + $0x68] sm:$0xff]  }
 0x32f   :  { %1691 = vmatprep.mubr.bf16.mxu0 %v1268_v61  ;;  %1790 = vmatprep.mubr.bf16.mxu1 %v1268_v61  ;;  %v3248_v31 = vld [vmem:[#allocation10 + $0x20] sm:$0xff]  }
 0x330   :  { %1692 = vmatmul.mubr.bf16.gmra.mrb[92].mxu0 %v1267_v42  ;;  %1791 = vmatmul.mubr.bf16.gmra.mrb[92].mxu1 %v1267_v42  ;;  %v3250_v42 = vld [vmem:[#allocation10 + $0x28] sm:$0xff]  }
 0x331   :  { %2054 = vmatprep.mubr.bf16.mxu0 %v3416_v34  ;;  %2025 = vmatpush1.bf16.msra.mxu0 %v3218_v6  ;;  %v3232_v34 = vld [vmem:[#allocation8 + $0x54] ss:$8 sps:$4 sm:$0xff]  }
 0x332   :  { %2026 = vmatprep.subr.bf16.mxu0 %v3223_v11  ;;  %2886 = vmatprep.subr.bf16.mxu1 %v3241_v44 }
 0x333   :  { %2887 = vmatpush3.bf16.msra.mxu1 %v3242_v52 }
 0x334   :  { %2888 = vmatprep.subr.bf16.mxu1 %v3243_v53 }
 0x335   :  { %2027 = vmatpush1.bf16.msra.mxu0 %v3221_v15 }
 0x336   :  { %2028 = vmatprep.subr.bf16.mxu0 %v3226_v10 }
 0x337   :  { %2889 = vmatpush3.bf16.msra.mxu1 %v3244_v62 }
 0x338   :  { %2890 = vmatprep.subr.bf16.mxu1 %v3245_v30 }
 0x339   :  { %2029 = vmatpush1.bf16.msra.mxu0 %v3224_v23 }
 0x33a   :  { %2030 = vmatprep.subr.bf16.mxu0 %v3229_v19 }
 0x33b   :  { %2891 = vmatpush3.bf16.msra.mxu1 %v3246_v0 }
 0x33c   :  { %2892 = vmatprep.subr.bf16.mxu1 %v3247_v37 }
 0x33d   :  { %2031 = vmatpush1.bf16.msra.mxu0 %v3227_v46 }
 0x33e   :  { %2032 = vmatprep.subr.bf16.mxu0 %v3232_v34 }
 0x33f   :  { %2893 = vmatpush3.bf16.msra.mxu1 %v3248_v31 }
 0x340   :  { %2894 = vmatprep.subr.bf16.mxu1 %v3249_v59 }
 0x341   :  { %2033 = vmatpush1.bf16.msra.mxu0 %v3230_v43 }
 0x342   :  { %2034 = vmatprep.subr.bf16.mxu0 %v3235_v32  ;;  %v3859_v32 = vld [vmem:[%s4139_s8 + $0x3] ss:$0 sm:$0xff] }
 0x343   :  { %2895 = vmatpush3.bf16.msra.mxu1 %v3250_v42 }
 0x345   :  { %2035 = vmatpush1.bf16.msra.mxu0 %v3233_v12 }
 0x346   :  { %2036 = vmatprep.subr.bf16.mxu0 %v3238_v39 }
 0x349   :  { %2037 = vmatpush1.bf16.msra.mxu0 %v3236_v40 }
 0x3cb   :  { %v1623_v61 = vpop.f32.mrb[64].mxu0  ;;  %v2836_v35 = vpop.f32.mrb[64].mxu1 }
 0x3cc   :  { %v1625_v1 = vpop.f32.mrb[65].mxu0  ;;  %v2837_v6 = vpop.f32.mrb[65].mxu1  ;;  %v1799_v40 = vadd.f32 %v1623_v61, %v3859_v32 }
 0x3cd   :  { %v3848_v4 = vadd.f32 %v1625_v1, %v3720_v17  ;;  %v2838_v11 = vadd.f32 %v2837_v6, %v2836_v35  ;;  %v1627_v15 = vpop.f32.mrb[66].mxu0  ;;  %v2839_v10 = vpop.f32.mrb[66].mxu1 }
 0x3ce   :  { %v1629_v23 = vpop.f32.mrb[67].mxu0  ;;  %v2840_v19 = vpop.f32.mrb[67].mxu1  ;;  %v1800_v62 = vadd.f32 %v1627_v15, %v3859_v32 }
 0x3cf   :  { %v3851_v46 = vadd.f32 %v2838_v11, %v3724_v26  ;;  %v3854_v34 = vadd.f32 %v1629_v23, %v3728_v36  ;;  %v2841_v43 = vadd.f32 %v2840_v19, %v2839_v10 }
 0x3d1   :  { %v3862_v17 = vadd.f32 %v2841_v43, %v3732_v2 }
 0x3d3   :  { %v1633_v12 = vpop.f32.mrb[68].mxu0  ;;  %v2842_v39 = vpop.f32.mrb[68].mxu1 }
 0x3d4   :  { %v1801_v27 = vadd.f32 %v1633_v12, %v3859_v32  ;;  %v1635_v26 = vpop.f32.mrb[69].mxu0  ;;  %v2843_v45 = vpop.f32.mrb[69].mxu1 }
 0x3d5   :  { %v3867_v36 = vadd.f32 %v1635_v26, %v3736_v7  ;;  %v2844_v44 = vadd.f32 %v2843_v45, %v2842_v39  ;;  %v1637_v52 = vpop.f32.mrb[70].mxu0  ;;  %v2845_v53 = vpop.f32.mrb[70].mxu1 }
 0x3d6   :  { %v1890_v30 = vmax.f32 %v1799_v40, %v1801_v27  ;;  %v1802_v2 = vadd.f32 %v1637_v52, %v3859_v32  ;;  %v1639_v0 = vpop.f32.mrb[71].mxu0  ;;  %v2846_v37 = vpop.f32.mrb[71].mxu1 }
 0x3d7   :  { %v3872_v31 = vadd.f32 %v2844_v44, %v3740_v9  ;;  %v3875_v59 = vadd.f32 %v1639_v0, %v3744_v18  ;;  %v2847_v42 = vadd.f32 %v2846_v37, %v2845_v53 }
 0x3d8   :  { %v1891_v61 = vmax.f32 %v1800_v62, %v1802_v2 }
 0x3d9   :  { %v3878_v7 = vadd.f32 %v2847_v42, %v3748_v29 }
 0x3db   :  { %v1643_v35 = vpop.f32.mrb[72].mxu0  ;;  %v2848_v1 = vpop.f32.mrb[72].mxu1 }
 0x3dc   :  { %v1803_v6 = vadd.f32 %v1643_v35, %v3859_v32  ;;  %v1645_v11 = vpop.f32.mrb[73].mxu0  ;;  %v2849_v15 = vpop.f32.mrb[73].mxu1 }
 0x3dd   :  { %v3882_v10 = vadd.f32 %v1645_v11, %v3752_v49  ;;  %v2850_v23 = vadd.f32 %v2849_v15, %v2848_v1  ;;  %v1647_v9 = vpop.f32.mrb[74].mxu0  ;;  %v2851_v19 = vpop.f32.mrb[74].mxu1 }
 0x3de   :  { %v1892_v43 = vmax.f32 %v1890_v30, %v1803_v6  ;;  %v1804_v18 = vadd.f32 %v1647_v9, %v3859_v32  ;;  %v1649_v12 = vpop.f32.mrb[75].mxu0  ;;  %v2852_v39 = vpop.f32.mrb[75].mxu1 }
 0x3df   :  { %v3886_v29 = vadd.f32 %v2850_v23, %v3756_v8  ;;  %v3889_v40 = vadd.f32 %v1649_v12, %v3760_v55  ;;  %v2853_v27 = vadd.f32 %v2852_v39, %v2851_v19 }
 0x3e0   :  { %v1893_v26 = vmax.f32 %v1891_v61, %v1804_v18 }
 0x3e1   :  { %v3892_v45 = vadd.f32 %v2853_v27, %v3764_v14 }
 0x3e3   :  { %v1653_v49 = vpop.f32.mrb[76].mxu0  ;;  %v2854_v44 = vpop.f32.mrb[76].mxu1 }
 0x3e4   :  { %v1805_v52 = vadd.f32 %v1653_v49, %v3859_v32  ;;  %v1655_v53 = vpop.f32.mrb[77].mxu0  ;;  %v2855_v62 = vpop.f32.mrb[77].mxu1 }
 0x3e5   :  { %v3896_v30 = vadd.f32 %v1655_v53, %v3768_v33  ;;  %v2856_v2 = vadd.f32 %v2855_v62, %v2854_v44  ;;  %v1657_v8 = vpop.f32.mrb[78].mxu0  ;;  %v2857_v0 = vpop.f32.mrb[78].mxu1 }
 0x3e6   :  { %v1894_v37 = vmax.f32 %v1892_v43, %v1805_v52  ;;  %v1806_v55 = vadd.f32 %v1657_v8, %v3859_v32  ;;  %v1659_v42 = vpop.f32.mrb[79].mxu0  ;;  %v2858_v61 = vpop.f32.mrb[79].mxu1 }
 0x3e7   :  { %v3900_v14 = vadd.f32 %v2856_v2, %v3772_v28  ;;  %v3903_v35 = vadd.f32 %v1659_v42, %v3776_v50  ;;  %v2859_v1 = vadd.f32 %v2858_v61, %v2857_v0 }
 0x3e8   :  { %v1895_v6 = vmax.f32 %v1893_v26, %v1806_v55 }
 0x3e9   :  { %v3906_v11 = vadd.f32 %v2859_v1, %v3780_v63 }
 0x3ea   :  { %v1896_v33 = vmax.f32 %v1894_v37, %v1895_v6 }
 0x3eb   :  { %v1663_v15 = vpop.f32.mrb[80].mxu0  ;;  %v2860_v23 = vpop.f32.mrb[80].mxu1 }
 0x3ec   :  { %v1665_v9 = vpop.f32.mrb[81].mxu0  ;;  %v2861_v19 = vpop.f32.mrb[81].mxu1 }
 0x3ed   :  { %v3909_v43 = vadd.f32 %v1665_v9, %v3784_v16  ;;  %v2862_v18 = vadd.f32 %v2861_v19, %v2860_v23  ;;  %v1667_v12 = vpop.f32.mrb[82].mxu0  ;;  %v2863_v28 = vpop.f32.mrb[82].mxu1  ;;  %v1807_v16 = vadd.f32 %v1663_v15, %v3859_v32 }
 0x3ee   :  { %v1669_v39 = vpop.f32.mrb[83].mxu0  ;;  %v2864_v27 = vpop.f32.mrb[83].mxu1 }
 0x3ef   :  { %v3912_v50 = vadd.f32 %v2862_v18, %v3788_v25  ;;  %v3915_v26 = vadd.f32 %v1669_v39, %v3792_v38  ;;  %v2865_v63 = vadd.f32 %v2864_v27, %v2863_v28  ;;  %v1808_v38 = vadd.f32 %v1667_v12, %v3859_v32 }
 0x3f1   :  { %v3918_v49 = vadd.f32 %v2865_v63, %v3796_v41 }
 0x3f3   :  { %v1673_v44 = vpop.f32.mrb[84].mxu0  ;;  %v2866_v52 = vpop.f32.mrb[84].mxu1 }
 0x3f4   :  { %v1809_v53 = vadd.f32 %v1673_v44, %v3859_v32  ;;  %v1675_v62 = vpop.f32.mrb[85].mxu0  ;;  %v2867_v2 = vpop.f32.mrb[85].mxu1  ;;  %v1897_v44 = vrot.slane %v1896_v33, 4 }
 0x3f5   :  { %v3923_v8 = vadd.f32 %v1675_v62, %v3800_v54  ;;  %v2868_v25 = vadd.f32 %v2867_v2, %v2866_v52  ;;  %v1677_v0 = vpop.f32.mrb[86].mxu0  ;;  %v2869_v37 = vpop.f32.mrb[86].mxu1 }
 0x3f6   :  { %v1903_v55 = vmax.f32 %v1807_v16, %v1809_v53  ;;  %v1810_v41 = vadd.f32 %v1677_v0, %v3859_v32  ;;  %v1679_v42 = vpop.f32.mrb[87].mxu0  ;;  %v2870_v61 = vpop.f32.mrb[87].mxu1  ;;  %v1898_v0 = vmax.f32 %v1896_v33, %v1897_v44 }
 0x3f7   :  { %v3928_v1 = vadd.f32 %v2868_v25, %v3804_v51  ;;  %v3931_v6 = vadd.f32 %v1679_v42, %v3808_v21  ;;  %v2871_v15 = vadd.f32 %v2870_v61, %v2869_v37 }
 0x3f8   :  { %v1904_v23 = vmax.f32 %v1808_v38, %v1810_v41 }
 0x3f9   :  { %v3934_v54 = vadd.f32 %v2871_v15, %v3812_v3 }
 0x3fb   :  { %v1683_v9 = vpop.f32.mrb[88].mxu0  ;;  %v2872_v19 = vpop.f32.mrb[88].mxu1 }
 0x3fc   :  { %v1811_v18 = vadd.f32 %v1683_v9, %v3859_v32  ;;  %v1685_v12 = vpop.f32.mrb[89].mxu0  ;;  %v2873_v28 = vpop.f32.mrb[89].mxu1 }
 0x3fd   :  { %v3938_v39 = vadd.f32 %v1685_v12, %v3816_v24  ;;  %v2874_v27 = vadd.f32 %v2873_v28, %v2872_v19  ;;  %v1687_v51 = vpop.f32.mrb[90].mxu0  ;;  %v2875_v63 = vpop.f32.mrb[90].mxu1 }
 0x3fe   :  { %v1905_v21 = vmax.f32 %v1903_v55, %v1811_v18  ;;  %v1812_v52 = vadd.f32 %v1687_v51, %v3859_v32  ;;  %v1689_v16 = vpop.f32.mrb[91].mxu0  ;;  %v2876_v53 = vpop.f32.mrb[91].mxu1 }
 0x3ff   :  { %v3942_v3 = vadd.f32 %v2874_v27, %v3820_v48  ;;  %v3945_v62 = vadd.f32 %v1689_v16, %v3824_v56  ;;  %v2877_v2 = vadd.f32 %v2876_v53, %v2875_v63  ;;  %v1899_v56 = vrot.slane %v1898_v0, 2 }
 0x400   :  { %v1906_v25 = vmax.f32 %v1904_v23, %v1812_v52 }
 0x401   :  { %v3948_v24 = vadd.f32 %v2877_v2, %v3828_v22  ;;  %v1900_v51 = vmax.f32 %v1898_v0, %v1899_v56  ;;  %v3252_v0 = vld [vmem:[#allocation10 + $0x30] sm:$0xff]   ;;  %v3257_v56 = vld [vmem:[%s4138_s7 + $0x10] sm:$0xff]  }
 0x403   :  { %v1693_v37 = vpop.f32.mrb[92].mxu0  ;;  %v2878_v38 = vpop.f32.mrb[92].mxu1  ;;  %v1901_v52 = vrot.slane %v1900_v51, 1 }
 0x404   :  { %v1813_v55 = vadd.f32 %v1693_v37, %v3859_v32  ;;  %v1695_v41 = vpop.f32.mrb[93].mxu0  ;;  %v2879_v42 = vpop.f32.mrb[93].mxu1 }
 0x405   :  { %v3952_v61 = vadd.f32 %v1695_v41, %v3832_v47  ;;  %v2880_v48 = vadd.f32 %v2879_v42, %v2878_v38  ;;  %v1697_v15 = vpop.f32.mrb[94].mxu0  ;;  %v2881_v9 = vpop.f32.mrb[94].mxu1  ;;  %v3253_v42 = vld [vmem:[#allocation10 + $0x78] sm:$0xff]  }
 0x406   :  { %v1907_v19 = vmax.f32 %v1905_v21, %v1813_v55  ;;  %v1814_v23 = vadd.f32 %v1697_v15, %v3859_v32  ;;  %v1699_v18 = vpop.f32.mrb[95].mxu0  ;;  %v2882_v22 = vpop.f32.mrb[95].mxu1  ;;  %v1902_v32 = vmax.f32 %v1900_v51, %v1901_v52  ;;  %v3255_v15 = vld [vmem:[%s4138_s7] sm:$0xff]  }
 0x407   :  { %v3956_v33 = vadd.f32 %v2880_v48, %v3836_v13  ;;  %v3959_v12 = vadd.f32 %v1699_v18, %v3840_v5  ;;  %v2883_v28 = vadd.f32 %v2882_v22, %v2881_v9  ;;  %v3254_v48 = vld [vmem:[#allocation10 + $0x38] sm:$0xff]   ;;  %v3256_v9 = vld [vmem:[%s4138_s7 + $0x8] sm:$0xff]   ;;  %3014 = vmatprep.subr.bf16.mxu0 %v3255_v15 }
 0x408   :  { %v1908_v27 = vmax.f32 %v1906_v25, %v1814_v23  ;;  %v1916_v37 = vpack.c.bf16 %v1902_v32, %v1902_v32  ;;  %v2634_v18 = vld [vmem:[%s4139_s8 + $0x4] ss:$8 sm:$0x3] }
 0x409   :  { %v3962_v47 = vadd.f32 %v2883_v28, %v3844_v20  ;;  %v3251_v20 = vld [vmem:[#allocation10 + $0x70] sm:$0xff]   ;;  %v1851_v22 = vrot.slane %v2634_v18, %v3704_v58  ;;  %v1855_v28 = vrot.slane %v2634_v18, %v3710_v60 }
 0x40a   :  { %v1909_v63 = vmax.f32 %v1907_v19, %v1908_v27  ;;  %v1936_v5 = vunpack.c.l.b16 %v1916_v37  ;;  %2896 = vmatprep.subr.bf16.mxu1 %v3251_v20  ;;  %v3417_v19 = vmov 1966171168  }
 0x40b   :  { %2897 = vmatpush3.bf16.msra.mxu1 %v3252_v0  ;;  %v2067_v23 = vunpack.c.l.s4 %v3417_v19  ;;  %v1858_v51 = vadd.f32 %v1851_v22, %v3848_v4  ;;  %v1862_v32 = vadd.f32 %v1851_v22, %v3867_v36  ;;  %v1866_v4 = vadd.f32 %v1851_v22, %v3882_v10 }
 0x40c   :  { %v1910_v44 = vrot.slane %v1909_v63, 4  ;;  %2898 = vmatprep.subr.bf16.mxu1 %v3253_v42  ;;  %v1871_v36 = vadd.f32 %v1855_v28, %v3900_v14  ;;  %v4010_v14 = vadd.f32 %v1851_v22, %v3931_v6 }
 0x40d   :  { %v2068_v27 = vunpack.c.0.s8 %v2067_v23 }
 0x40e   :  { %v1911_v21 = vmax.f32 %v1909_v63, %v1910_v44  ;;  %v1859_v63 = vadd.f32 %v1855_v28, %v3851_v46  ;;  %v1860_v44 = vadd.f32 %v1851_v22, %v3854_v34  ;;  %v1867_v46 = vadd.f32 %v1855_v28, %v3886_v29 }
 0x40f   :  { %2899 = vmatpush3.bf16.msra.mxu1 %v3254_v48  ;;  %v1875_v29 = vadd.f32 %v1855_v28, %v3912_v50  ;;  %v4016_v50 = vadd.f32 %v1851_v22, %v3938_v39  ;;  %v4033_v39 = vadd.f32 %v1855_v28, %v3956_v33 }
 0x410   :  { %v1912_v16 = vrot.slane %v1911_v21, 2 }
 0x412   :  { %v1913_v53 = vmax.f32 %v1911_v21, %v1912_v16  ;;  %v2071_v21 = vsub.s32 %v2068_v27, %v3701_v57  ;;  %v1861_v16 = vadd.f32 %v1855_v28, %v3862_v17  ;;  %v1869_v57 = vadd.f32 %v1855_v28, %v3892_v45 }
 0x413   :  { %v1870_v17 = vadd.f32 %v1851_v22, %v3896_v30  ;;  %v4004_v45 = vadd.f32 %v1851_v22, %v3923_v8  ;;  %v4007_v30 = vadd.f32 %v1855_v28, %v3928_v1  ;;  %v4025_v8 = vadd.f32 %v1855_v28, %v3948_v24 }
 0x414   :  { %v1914_v2 = vrot.slane %v1913_v53, 1 }
 0x416   :  { %v1915_v13 = vmax.f32 %v1913_v53, %v1914_v2  ;;  %v1863_v53 = vadd.f32 %v1855_v28, %v3872_v31  ;;  %v1864_v2 = vadd.f32 %v1851_v22, %v3875_v59  ;;  %v1872_v59 = vadd.f32 %v1851_v22, %v3903_v35 }
 0x418   :  { %v1917_v38 = vpack.c.bf16 %v1915_v13, %v1915_v13  ;;  %v1865_v13 = vadd.f32 %v1855_v28, %v3878_v7  ;;  %v3996_v7 = vadd.f32 %v1851_v22, %v3909_v43  ;;  %v4013_v43 = vadd.f32 %v1855_v28, %v3934_v54 }
 0x419   :  { %v4030_v54 = vadd.f32 %v1851_v22, %v3952_v61 }
 0x41a   :  { %v1937_v55 = vunpack.c.l.b16 %v1917_v38 }
 0x41c   :  { %v1939_v41 = vsel %vm1938_vm2, %v1937_v55, %v1936_v5  ;;  %v1868_v5 = vadd.f32 %v1851_v22, %v3889_v40  ;;  %v1873_v55 = vadd.f32 %v1855_v28, %v3906_v11  ;;  %v1877_v40 = vadd.f32 %v1855_v28, %v3918_v49 }
 0x41d   :  { %v1940_v25 = vpack.c.b16 %v1939_v41, %v1939_v41  ;;  %v4000_v41 = vadd.f32 %v1851_v22, %v3915_v26  ;;  %v4019_v26 = vadd.f32 %v1855_v28, %v3942_v3  ;;  %v4022_v49 = vadd.f32 %v1851_v22, %v3945_v62 }
 0x41e   :  { %v4036_v3 = vadd.f32 %v1851_v22, %v3959_v12  ;;  %v4039_v62 = vadd.f32 %v1855_v28, %v3962_v47 }
 0x41f   :  { %2055 = vmatmul.mubr.bf16.vlgmr.msra.gmra.mrb[96].mxu0 %v1940_v25 }
 0x420   :  { %3015 = vmatpush3.bf16.msra.mxu0 %v3255_v15 }
 0x421   :  { %3016 = vmatprep.subr.bf16.mxu0 %v3256_v9 }
 0x424   :  { %3017 = vmatpush3.bf16.msra.mxu0 %v3256_v9 }
 0x425   :  { %3018 = vmatprep.subr.bf16.mxu0 %v3257_v56 }
 0x428   :  { %3019 = vmatpush3.bf16.msra.mxu0 %v3257_v56 }
 0x4f2   :  { %v2056_v52 = vpop.f32.mrb[96].mxu0 }
 0x4f3   :  { %v2058_v37 = vpop.f32.mrb[97].mxu0 }
 0x4f4   :  { %v2065_v38 = vcombine.low %v2056_v52, %v2058_v37  ;;  %v2060_v34 = vpop.f32.mrb[98].mxu0 }
 0x4f5   :  { %v2061_v31 = vpop.f32.mrb[99].mxu0 }
 0x4f6   :  { %v2072_v10 = vrot.slane %v2065_v38, %v2071_v21 }
 0x4f8   :  { %v2073_v35 = vcombine.high %v2072_v10, %v2072_v10  ;;  %v2080_v11 = vrot.slane %v2072_v10, %v2071_v21 }
 0x4fa   :  { %v2087_v1 = vrot.slane %v2073_v35, %v2071_v21  ;;  %v2091_v6 = vrot.slane %v2080_v11, %v3704_v58  ;;  %v2095_v25 = vrot.slane %v2080_v11, %v3710_v60 }
 0x4fc   :  { %v4042_v24 = vrot.slane %v2087_v1, %v3704_v58  ;;  %v4045_v20 = vrot.slane %v2087_v1, %v3710_v60  ;;  %v2109_v0 = vadd.f32 %v2095_v25, %v1859_v63  ;;  %v2111_v42 = vadd.f32 %v2095_v25, %v1861_v16 }
 0x4fd   :  { %v2108_v48 = vadd.f32 %v2091_v6, %v1858_v51  ;;  %v2110_v61 = vadd.f32 %v2091_v6, %v1860_v44  ;;  %v2113_v15 = vadd.f32 %v2095_v25, %v1863_v53  ;;  %v2115_v9 = vadd.f32 %v2095_v25, %v1865_v13 }
 0x4fe   :  { %v2141_v33 = vmax.f32 %v2109_v0, 0.0  ;;  %v2143_v56 = vmax.f32 %v2111_v42, 0.0  ;;  %v2112_v19 = vadd.f32 %v2091_v6, %v1862_v32  ;;  %v2114_v12 = vadd.f32 %v2091_v6, %v1864_v2 }
 0x4ff   :  { %v2140_v23 = vmax.f32 %v2108_v48, 0.0  ;;  %v2142_v18 = vmax.f32 %v2110_v61, 0.0  ;;  %v2145_v47 = vmax.f32 %v2113_v15, 0.0  ;;  %v2147_v22 = vmax.f32 %v2115_v9, 0.0 }
 0x500   :  { %v2173_v28 = vpack.c.bf16 %v2143_v56, %v2141_v33  ;;  %v2144_v58 = vmax.f32 %v2112_v19, 0.0  ;;  %v2146_v27 = vmax.f32 %v2114_v12, 0.0  ;;  %v2117_v52 = vadd.f32 %v2095_v25, %v1867_v46 }
 0x501   :  { %v2172_v60 = vpack.c.bf16 %v2142_v18, %v2140_v23  ;;  %v2175_v21 = vpack.c.bf16 %v2147_v22, %v2145_v47  ;;  %v2119_v63 = vadd.f32 %v2095_v25, %v1869_v57  ;;  %v2116_v16 = vadd.f32 %v2091_v6, %v1866_v4 }
 0x502   :  { %2348 = vmatprep.mubr.bf16.mxu1 %v2173_v28  ;;  %v2174_v51 = vpack.c.bf16 %v2146_v27, %v2144_v58  ;;  %v2149_v44 = vmax.f32 %v2117_v52, 0.0  ;;  %v2118_v53 = vadd.f32 %v2091_v6, %v1868_v5  ;;  %v2121_v37 = vadd.f32 %v2095_v25, %v1871_v36 }
 0x503   :  { %2349 = vmatmul.mubr.bf16.vlgmr.msra.gmra.mrb[96].mxu1 %v2172_v60  ;;  %v2151_v32 = vmax.f32 %v2119_v63, 0.0  ;;  %v2148_v2 = vmax.f32 %v2116_v16, 0.0  ;;  %v2123_v13 = vadd.f32 %v2095_v25, %v1873_v55  ;;  %v2120_v38 = vadd.f32 %v2091_v6, %v1870_v17 }
 0x504   :  { %2356 = vmatprep.mubr.bf16.mxu1 %v2175_v21  ;;  %v2150_v34 = vmax.f32 %v2118_v53, 0.0  ;;  %v2153_v31 = vmax.f32 %v2121_v37, 0.0  ;;  %v2122_v10 = vadd.f32 %v2091_v6, %v1872_v59  ;;  %v2125_v46 = vadd.f32 %v4045_v20, %v1875_v29 }
 0x505   :  { %v2177_v35 = vpack.c.bf16 %v2151_v32, %v2149_v44  ;;  %v2155_v11 = vmax.f32 %v2123_v13, 0.0  ;;  %v2152_v57 = vmax.f32 %v2120_v38, 0.0  ;;  %v2127_v4 = vadd.f32 %v4045_v20, %v1877_v40 }
 0x506   :  { %v2176_v1 = vpack.c.bf16 %v2150_v34, %v2148_v2  ;;  %v2154_v0 = vmax.f32 %v2122_v10, 0.0  ;;  %v2157_v5 = vmax.f32 %v2125_v46, 0.0  ;;  %v2124_v36 = vadd.f32 %v4042_v24, %v3996_v7 }
 0x507   :  { %v2179_v42 = vpack.c.bf16 %v2155_v11, %v2153_v31  ;;  %v2159_v55 = vmax.f32 %v2127_v4, 0.0  ;;  %v2126_v17 = vadd.f32 %v4042_v24, %v4000_v41  ;;  %v2129_v59 = vadd.f32 %v4045_v20, %v4007_v30 }
 0x508   :  { %v2178_v29 = vpack.c.bf16 %v2154_v0, %v2152_v57  ;;  %v2156_v6 = vmax.f32 %v2124_v36, 0.0  ;;  %v2131_v25 = vadd.f32 %v4045_v20, %v4013_v43  ;;  %v2128_v40 = vadd.f32 %v4042_v24, %v4004_v45 }
 0x509   :  { %v2181_v48 = vpack.c.bf16 %v2159_v55, %v2157_v5  ;;  %v2158_v61 = vmax.f32 %v2126_v17, 0.0  ;;  %v2161_v15 = vmax.f32 %v2129_v59, 0.0  ;;  %v2130_v7 = vadd.f32 %v4042_v24, %v4010_v14 }
 0x50a   :  { %v2163_v9 = vmax.f32 %v2131_v25, 0.0  ;;  %v2160_v33 = vmax.f32 %v2128_v40, 0.0  ;;  %v2133_v41 = vadd.f32 %v4045_v20, %v4019_v26  ;;  %v2135_v30 = vadd.f32 %v4045_v20, %v4025_v8 }
 0x50b   :  { %2357 = vmatmul.mubr.bf16.gmra.mrb[100].mxu1 %v2174_v51  ;;  %v2180_v56 = vpack.c.bf16 %v2158_v61, %v2156_v6  ;;  %v2162_v43 = vmax.f32 %v2130_v7, 0.0  ;;  %v2132_v45 = vadd.f32 %v4042_v24, %v4016_v50  ;;  %v2134_v19 = vadd.f32 %v4042_v24, %v4022_v49  ;;  %v4095_v51 = vld [vmem:[%s4139_s8 + $0x5] ss:$0 sm:$0xff] }
 0x50c   :  { %2364 = vmatprep.mubr.bf16.mxu1 %v2177_v35  ;;  %v2183_v12 = vpack.c.bf16 %v2163_v9, %v2161_v15  ;;  %v2165_v14 = vmax.f32 %v2133_v41, 0.0  ;;  %v2167_v23 = vmax.f32 %v2135_v30, 0.0  ;;  %v2137_v18 = vadd.f32 %v4045_v20, %v4033_v39 }
 0x50d   :  { %v2182_v26 = vpack.c.bf16 %v2162_v43, %v2160_v33  ;;  %v2164_v47 = vmax.f32 %v2132_v45, 0.0  ;;  %v2166_v22 = vmax.f32 %v2134_v19, 0.0  ;;  %v2139_v8 = vadd.f32 %v4045_v20, %v4039_v62  ;;  %v3260_v62 = vld [vmem:[%s4138_s7 + $0x28] sm:$0xff]   ;;  %v3262_v20 = vld [vmem:[%s4138_s7 + $0x38] sm:$0xff]  }
 0x50e   :  { %v2185_v28 = vpack.c.bf16 %v2167_v23, %v2165_v14  ;;  %v2169_v58 = vmax.f32 %v2137_v18, 0.0  ;;  %v2136_v50 = vadd.f32 %v4042_v24, %v4030_v54  ;;  %v2138_v49 = vadd.f32 %v4042_v24, %v4036_v3  ;;  %v3258_v54 = vld [vmem:[%s4138_s7 + $0x18] sm:$0xff]   ;;  %v3259_v3 = vld [vmem:[%s4138_s7 + $0x20] sm:$0xff]   ;;  %v3261_v24 = vld [vmem:[%s4138_s7 + $0x30] sm:$0xff]  }
 0x50f   :  { %v2184_v27 = vpack.c.bf16 %v2166_v22, %v2164_v47  ;;  %v2171_v52 = vmax.f32 %v2139_v8, 0.0  ;;  %3020 = vmatprep.subr.bf16.mxu0 %v3258_v54 }
 0x510   :  { %v2168_v60 = vmax.f32 %v2136_v50, 0.0  ;;  %v2170_v21 = vmax.f32 %v2138_v49, 0.0  ;;  %3021 = vmatpush3.bf16.msra.mxu0 %v3258_v54 }
 0x511   :  { %v2187_v63 = vpack.c.bf16 %v2171_v52, %v2169_v58  ;;  %3022 = vmatprep.subr.bf16.mxu0 %v3259_v3 }
 0x512   :  { %v2186_v39 = vpack.c.bf16 %v2170_v21, %v2168_v60 }
 0x513   :  { %2365 = vmatmul.mubr.bf16.gmra.mrb[104].mxu1 %v2176_v1 }
 0x514   :  { %2372 = vmatprep.mubr.bf16.mxu1 %v2179_v42  ;;  %3023 = vmatpush3.bf16.msra.mxu0 %v3259_v3 }
 0x515   :  { %3024 = vmatprep.subr.bf16.mxu0 %v3260_v62 }
 0x518   :  { %3025 = vmatpush3.bf16.msra.mxu0 %v3260_v62 }
 0x519   :  { %3026 = vmatprep.subr.bf16.mxu0 %v3261_v24 }
 0x51b   :  { %2373 = vmatmul.mubr.bf16.gmra.mrb[108].mxu1 %v2178_v29 }
 0x51c   :  { %2380 = vmatprep.mubr.bf16.mxu1 %v2181_v48  ;;  %3027 = vmatpush3.bf16.msra.mxu0 %v3261_v24 }
 0x51d   :  { %3028 = vmatprep.subr.bf16.mxu0 %v3262_v20 }
 0x520   :  { %3029 = vmatpush3.bf16.msra.mxu0 %v3262_v20 }
 0x523   :  { %2381 = vmatmul.mubr.bf16.gmra.mrb[112].mxu1 %v2180_v56 }
 0x524   :  { %2388 = vmatprep.mubr.bf16.mxu1 %v2183_v12 }
 0x52b   :  { %2389 = vmatmul.mubr.bf16.gmra.mrb[116].mxu1 %v2182_v26 }
 0x52c   :  { %2396 = vmatprep.mubr.bf16.mxu1 %v2185_v28 }
 0x533   :  { %2397 = vmatmul.mubr.bf16.gmra.mrb[120].mxu1 %v2184_v27 }
 0x534   :  { %2404 = vmatprep.mubr.bf16.mxu1 %v2187_v63 }
 0x53b   :  { %2405 = vmatmul.mubr.bf16.gmra.mrb[124].mxu1 %v2186_v39 }
 0x5d6   :  { %v2900_v16 = vpop.f32.mrb[96].mxu1 }
 0x5d7   :  { %v2901_v44 = vpop.f32.mrb[97].mxu1 }
 0x5d8   :  { %v2902_v53 = vadd.f32 %v2901_v44, %v2900_v16  ;;  %v2903_v37 = vpop.f32.mrb[98].mxu1 }
 0x5d9   :  { %v2904_v32 = vpop.f32.mrb[99].mxu1 }
 0x5da   :  { %v2351_v2 = vadd.f32 %v2902_v53, %v4095_v51  ;;  %v2905_v13 = vadd.f32 %v2904_v32, %v2903_v37 }
 0x5dc   :  { %v2354_v38 = vadd.f32 %v2905_v13, %v4095_v51  ;;  %v2413_v34 = vmax.f32 %v2351_v2, 0.0 }
 0x5de   :  { %v2414_v31 = vmax.f32 %v2354_v38, 0.0  ;;  %v2906_v10 = vpop.f32.mrb[100].mxu1 }
 0x5df   :  { %v2907_v46 = vpop.f32.mrb[101].mxu1 }
 0x5e0   :  { %v2908_v35 = vadd.f32 %v2907_v46, %v2906_v10  ;;  %v2909_v11 = vpop.f32.mrb[102].mxu1  ;;  %v2429_v57 = vpack.c.bf16 %v2414_v31, %v2413_v34 }
 0x5e1   :  { %v2910_v4 = vpop.f32.mrb[103].mxu1 }
 0x5e2   :  { %v2359_v1 = vadd.f32 %v2908_v35, %v4095_v51  ;;  %v2911_v0 = vadd.f32 %v2910_v4, %v2909_v11  ;;  %3030 = vmatprep.mubr.bf16.mxu0 %v2429_v57 }
 0x5e4   :  { %v2362_v5 = vadd.f32 %v2911_v0, %v4095_v51  ;;  %v2415_v36 = vmax.f32 %v2359_v1, 0.0 }
 0x5e6   :  { %v2416_v42 = vmax.f32 %v2362_v5, 0.0  ;;  %v2912_v55 = vpop.f32.mrb[104].mxu1 }
 0x5e7   :  { %v2913_v17 = vpop.f32.mrb[105].mxu1 }
 0x5e8   :  { %v2430_v59 = vpack.c.bf16 %v2416_v42, %v2415_v36  ;;  %v2914_v29 = vadd.f32 %v2913_v17, %v2912_v55  ;;  %v2915_v6 = vpop.f32.mrb[106].mxu1 }
 0x5e9   :  { %v2916_v25 = vpop.f32.mrb[107].mxu1 }
 0x5ea   :  { %v2367_v40 = vadd.f32 %v2914_v29, %v4095_v51  ;;  %v2917_v48 = vadd.f32 %v2916_v25, %v2915_v6  ;;  %3031 = vmatmul.mubr.bf16.vlgmr.msra.gmra.mrb[100].mxu0 %v2430_v59  ;;  %v110_v6 = vld [vmem:[%s4139_s8 + $0x6] ss:$0 sm:$0xff]  ;;  %s3418_s8 = smov [#allocation11]  }
 0x5eb   :  { %s2619_s30 = sshll.u32 %s3418_s8, 4  ;;  %s2620_s30 = int_to_ptr.vmem [resolvable:$true] %s2619_s30 }
 0x5ec   :  { %v2370_v61 = vadd.f32 %v2917_v48, %v4095_v51  ;;  %v2417_v15 = vmax.f32 %v2367_v40, 0.0  ;;  %s3373_s4 = scalar_lea.vmem %s2620_s30, 2048  ;;  %p3378_p13 = scmp.lt.s32.totalorder %s2620_s30, %s2620_s30 }
 0x5ed   :  { %p3374_p12 = scmp.ne.s32.totalorder %s2620_s30, %s3373_s4  ;;  %p3379_p0 = scmp.lt.s32.totalorder %s3373_s4, %s3373_s4 }
 0x5ee   :  { %v2418_v7 = vmax.f32 %v2370_v61, 0.0  ;;  %v2918_v9 = vpop.f32.mrb[108].mxu1 }
 0x5ef   :  { %v2919_v33 = vpop.f32.mrb[109].mxu1  ;;  %p3380_p1 = por %p3379_p0, %p3378_p13 }
 0x5f0   :  { %v2920_v41 = vadd.f32 %v2919_v33, %v2918_v9  ;;  %v2921_v30 = vpop.f32.mrb[110].mxu1  ;;  %v2431_v56 = vpack.c.bf16 %v2418_v7, %v2417_v15 }
 0x5f1   :  { %v2922_v43 = vpop.f32.mrb[111].mxu1  ;;  %p3381_p2 = pnand %p3380_p1, %p3374_p12 }
 0x5f2   :  { %v2375_v45 = vadd.f32 %v2920_v41, %v4095_v51  ;;  %v2923_v19 = vadd.f32 %v2922_v43, %v2921_v30  ;;  %3034 = vmatprep.mubr.bf16.mxu0 %v2431_v56 }
 0x5f4   :  { %v2378_v12 = vadd.f32 %v2923_v19, %v4095_v51  ;;  %v2419_v14 = vmax.f32 %v2375_v45, 0.0 }
 0x5f6   :  { %v2420_v23 = vmax.f32 %v2378_v12, 0.0  ;;  %v2924_v18 = vpop.f32.mrb[112].mxu1 }
 0x5f7   :  { %v2925_v26 = vpop.f32.mrb[113].mxu1 }
 0x5f8   :  { %v2926_v47 = vadd.f32 %v2925_v26, %v2924_v18  ;;  %v2927_v22 = vpop.f32.mrb[114].mxu1  ;;  %v2432_v8 = vpack.c.bf16 %v2420_v23, %v2419_v14 }
 0x5f9   :  { %v2928_v28 = vpop.f32.mrb[115].mxu1 }
 0x5fa   :  { %v2383_v58 = vadd.f32 %v2926_v47, %v4095_v51  ;;  %v2929_v50 = vadd.f32 %v2928_v28, %v2927_v22  ;;  %3035 = vmatmul.mubr.bf16.gmra.mrb[104].mxu0 %v2432_v8 }
 0x5fc   :  { %v2386_v49 = vadd.f32 %v2929_v50, %v4095_v51  ;;  %v2421_v27 = vmax.f32 %v2383_v58, 0.0 }
 0x5fe   :  { %v2422_v52 = vmax.f32 %v2386_v49, 0.0  ;;  %v2930_v60 = vpop.f32.mrb[116].mxu1 }
 0x5ff   :  { %v2931_v21 = vpop.f32.mrb[117].mxu1 }
 0x600   :  { %v2932_v63 = vadd.f32 %v2931_v21, %v2930_v60  ;;  %v2933_v39 = vpop.f32.mrb[118].mxu1  ;;  %v2433_v54 = vpack.c.bf16 %v2422_v52, %v2421_v27 }
 0x601   :  { %v2934_v3 = vpop.f32.mrb[119].mxu1 }
 0x602   :  { %v2391_v62 = vadd.f32 %v2932_v63, %v4095_v51  ;;  %v2935_v24 = vadd.f32 %v2934_v3, %v2933_v39  ;;  %3038 = vmatprep.mubr.bf16.mxu0 %v2433_v54 }
 0x604   :  { %v2394_v20 = vadd.f32 %v2935_v24, %v4095_v51  ;;  %v2423_v16 = vmax.f32 %v2391_v62, 0.0 }
 0x606   :  { %v2424_v44 = vmax.f32 %v2394_v20, 0.0  ;;  %v2936_v53 = vpop.f32.mrb[120].mxu1 }
 0x607   :  { %v2937_v37 = vpop.f32.mrb[121].mxu1 }
 0x608   :  { %v2938_v32 = vadd.f32 %v2937_v37, %v2936_v53  ;;  %v2939_v2 = vpop.f32.mrb[122].mxu1  ;;  %v2434_v13 = vpack.c.bf16 %v2424_v44, %v2423_v16 }
 0x609   :  { %v2940_v38 = vpop.f32.mrb[123].mxu1 }
 0x60a   :  { %v2399_v34 = vadd.f32 %v2938_v32, %v4095_v51  ;;  %v2941_v31 = vadd.f32 %v2940_v38, %v2939_v2  ;;  %3039 = vmatmul.mubr.bf16.gmra.mrb[108].mxu0 %v2434_v13 }
 0x60c   :  { %v2402_v10 = vadd.f32 %v2941_v31, %v4095_v51  ;;  %v2425_v46 = vmax.f32 %v2399_v34, 0.0 }
 0x60e   :  { %v2426_v35 = vmax.f32 %v2402_v10, 0.0  ;;  %v2942_v11 = vpop.f32.mrb[124].mxu1 }
 0x60f   :  { %v2943_v57 = vpop.f32.mrb[125].mxu1 }
 0x610   :  { %v2944_v4 = vadd.f32 %v2943_v57, %v2942_v11  ;;  %v2945_v1 = vpop.f32.mrb[126].mxu1  ;;  %v2435_v0 = vpack.c.bf16 %v2426_v35, %v2425_v46 }
 0x611   :  { %v2946_v5 = vpop.f32.mrb[127].mxu1 }
 0x612   :  { %v2407_v36 = vadd.f32 %v2944_v4, %v4095_v51  ;;  %v2947_v42 = vadd.f32 %v2946_v5, %v2945_v1  ;;  %3042 = vmatprep.mubr.bf16.mxu0 %v2435_v0 }
 0x614   :  { %v2410_v55 = vadd.f32 %v2947_v42, %v4095_v51  ;;  %v2427_v17 = vmax.f32 %v2407_v36, 0.0 }
 0x616   :  { %v2428_v59 = vmax.f32 %v2410_v55, 0.0 }
 0x618   :  { %v2436_v29 = vpack.c.bf16 %v2428_v59, %v2427_v17 }
 0x61a   :  { %3043 = vmatmul.mubr.bf16.gmra.mrb[112].mxu0 %v2436_v29 }
 0x6bd   :  { %v3032_v25 = vpop.f32.mrb[100].mxu0 }
 0x6be   :  { %v2544_v40 = vadd.f32 %v3032_v25, %v110_v6  ;;  %v2535_v48 = vpop.f32.mrb[101].mxu0 }
 0x6bf   :  { %v2536_v61 = vadd.f32 %v2535_v48, %v110_v6  ;;  %v3033_v15 = vpop.f32.mrb[102].mxu0 }
 0x6c0   :  { %2600 = vst [vmem:[#allocation11 + $0x10] sm:$0xff] %v2544_v40  ;;  %v2547_v7 = vadd.f32 %v3033_v15, %v110_v6  ;;  %v2538_v9 = vpop.f32.mrb[103].mxu0 }
 0x6c1   :  { %2598 = vst [vmem:[#allocation11] sm:$0xff] %v2536_v61  ;;  %v2539_v33 = vadd.f32 %v2538_v9, %v110_v6 }
 0x6c2   :  { %2601 = vst [vmem:[#allocation11 + $0x18] sm:$0xff] %v2547_v7 }
 0x6c3   :  { %2599 = vst [vmem:[#allocation11 + $0x8] sm:$0xff] %v2539_v33 }
 0x6cd   :  { %v3036_v51 = vpop.f32.mrb[104].mxu0 }
 0x6ce   :  { %v2560_v41 = vadd.f32 %v3036_v51, %v110_v6  ;;  %v2551_v30 = vpop.f32.mrb[105].mxu0 }
 0x6cf   :  { %v2552_v56 = vadd.f32 %v2551_v30, %v110_v6  ;;  %v3037_v43 = vpop.f32.mrb[106].mxu0 }
 0x6d0   :  { %2604 = vst [vmem:[#allocation11 + $0x30] sm:$0xff] %v2560_v41  ;;  %v2563_v45 = vadd.f32 %v3037_v43, %v110_v6  ;;  %v2554_v19 = vpop.f32.mrb[107].mxu0 }
 0x6d1   :  { %2602 = vst [vmem:[#allocation11 + $0x20] sm:$0xff] %v2552_v56  ;;  %v2555_v12 = vadd.f32 %v2554_v19, %v110_v6 }
 0x6d2   :  { %2605 = vst [vmem:[#allocation11 + $0x38] sm:$0xff] %v2563_v45 }
 0x6d3   :  { %2603 = vst [vmem:[#allocation11 + $0x28] sm:$0xff] %v2555_v12 }
 0x6dd   :  { %v3040_v14 = vpop.f32.mrb[108].mxu0 }
 0x6de   :  { %v2576_v23 = vadd.f32 %v3040_v14, %v110_v6  ;;  %v2567_v18 = vpop.f32.mrb[109].mxu0 }
 0x6df   :  { %v2568_v26 = vadd.f32 %v2567_v18, %v110_v6  ;;  %v3041_v47 = vpop.f32.mrb[110].mxu0 }
 0x6e0   :  { %2608 = vst [vmem:[#allocation11 + $0x50] sm:$0xff] %v2576_v23  ;;  %v2579_v22 = vadd.f32 %v3041_v47, %v110_v6  ;;  %v2570_v8 = vpop.f32.mrb[111].mxu0 }
 0x6e1   :  { %2606 = vst [vmem:[#allocation11 + $0x40] sm:$0xff] %v2568_v26  ;;  %v2571_v28 = vadd.f32 %v2570_v8, %v110_v6 }
 0x6e2   :  { %2609 = vst [vmem:[#allocation11 + $0x58] sm:$0xff] %v2579_v22 }
 0x6e3   :  { %2607 = vst [vmem:[#allocation11 + $0x48] sm:$0xff] %v2571_v28 }
 0x6ed   :  { %v3044_v58 = vpop.f32.mrb[112].mxu0 }
 0x6ee   :  { %v2592_v50 = vadd.f32 %v3044_v58, %v110_v6  ;;  %v2583_v49 = vpop.f32.mrb[113].mxu0 }
 0x6ef   :  { %v2584_v27 = vadd.f32 %v2583_v49, %v110_v6  ;;  %v3045_v52 = vpop.f32.mrb[114].mxu0 }
 0x6f0   :  { %2612 = vst [vmem:[#allocation11 + $0x70] sm:$0xff] %v2592_v50  ;;  %v2595_v60 = vadd.f32 %v3045_v52, %v110_v6  ;;  %v2586_v21 = vpop.f32.mrb[115].mxu0 }
 0x6f1   :  { %2610 = vst [vmem:[#allocation11 + $0x60] sm:$0xff] %v2584_v27  ;;  %v2587_v63 = vadd.f32 %v2586_v21, %v110_v6 }
 0x6f2   :  { %2613 = vst [vmem:[#allocation11 + $0x78] sm:$0xff] %v2595_v60 }
 0x6f3   :  { %2611 = vst [vmem:[#allocation11 + $0x68] sm:$0xff] %v2587_v63 }
 0x6f4   :  { %3384 = shalt.err (!%p3381_p2)
}
 0x6f5   :  { %s3385_s29 = scalar_lea.hbm %s4140_s9, 2048 }
 0x6f6   :  { %p3386_p3 = scmp.ne.s32.totalorder %s4140_s9, %s3385_s29  ;;  %p3389_p4 = scmp.lt.u32.totalorder %s3385_s29, %s4140_s9 }
 0x6f8   :  { %p3391_p5 = pnand %p3389_p4, %p3386_p3 }
 0x6fa   :  { %3394 = shalt.err (!%p3391_p5)
}
 0x6fb   :  { %2625 = dma.vmem_to_hbm [thread:$0]  %s2620_s30, 2048, %s4140_s9, [#allocation4], %s3407_s3, %s3407_s3, %s3408_s10  }
 0x6fc   :  { %3401 = dma.done.wait [#allocation4], 2048  }
 0x6fd   :  { %3402 = vsyncadd [#allocation4], 4294965248 }
 0x6fe   :  { %2629 = vsyncpa [#allocation3], 1 }
 0x6ff   :  { %2630 = vsyncpa [#allocation6], 1 }
 0x700   :  { %2631 = vsyncpa [#allocation9], 1 }
 0x701   :  { %2632 = vsyncpa [#allocation4], 1 }

</bundles_post_ra>
